<compile_context>
chip_gen: v7x
topology: tpu7x:2x2x1
jax: 0.10.0
libtpu: 0.0.40
codegen_flags: <defaults>
</compile_context>

<pallas_src>
import functools

import jax
import jax.numpy as jnp
from jax.experimental import pallas as pl
from jax.experimental.pallas import tpu as pltpu


def _round_up(x: int, m: int) -> int:
    return ((x + m - 1) // m) * m


def _vmem_limit_bytes() -> int:
    """Generation-aware scoped-VMEM limit (v5e/v6e: 128 MiB phys, v7x: 64 MiB)."""
    phys = None
    try:
        info = pltpu.get_tpu_info()
        phys = getattr(info, "vmem_capacity_bytes", None)
    except Exception:
        phys = None
    if not phys:
        phys = 64 << 20                    # conservative default (v7x-sized VMEM)
    phys = int(phys)
    return int(max(32 << 20, min(phys - (8 << 20), 112 << 20)))


def _fixed_vmem_bytes(Np: int, Dp: int, csz: int, num_layers: int) -> int:
    """VMEM that is resident regardless of the adj streaming choice."""
    b = 2 * Np * Dp * csz                  # feats0 resident input (x2 pipeline bufs)
    b += 2 * Dp * Dp * csz                 # W block (x2)
    if num_layers >= 2:
        b += Np * Dp * csz                 # feature ping-pong scratch A
        b += Np * Dp * 4                   # running-average scratch (f32)
    if num_layers >= 3:
        b += Np * Dp * csz                 # feature ping-pong scratch B
    return b


def _choose_tiling(N, Dp, csz, num_layers, budget, tm=None):
    if tm is None:
        if N <= 256:
            cand = [_round_up(max(N, 16), 16)]
        else:
            cand = [256, 128, 64, 32, 16]
        tm = cand[-1]
        for t in cand:
            Np_t = _round_up(N, t)
            need = (_fixed_vmem_bytes(Np_t, Dp, csz, num_layers)
                    + 2 * t * Np_t * csz   # double-buffered adj row-tile stream
                    + 2 * t * Dp * 4)      # double-buffered output block
            if need <= budget:
                tm = t
                break
    assert tm % 16 == 0, "tm must be a multiple of 16 (bf16 sublane packing)"
    Np = _round_up(N, tm)
    resident_ok = (_fixed_vmem_bytes(Np, Dp, csz, num_layers)
                   + 2 * Np * Np * csz + 2 * tm * Dp * 4) <= budget
    return tm, Np, resident_ok


def sessconv_kernel(adj_ref, feats0_ref, w_ref, out_ref, *scratch,
                    num_layers: int, tm: int, adj_resident: bool):
    l = pl.program_id(0)                   # layer index
    i = pl.program_id(1)                   # row tile index
    row0 = pl.multiple_of(i * tm, tm)
    cdt = feats0_ref.dtype                 # MXU / feature-carry dtype
    inv_k = 1.0 / (num_layers + 1)
    prec = jax.lax.Precision.HIGHEST if cdt == jnp.float32 else None

    if num_layers == 1:
        feats_a = feats_b = avg_ref = None
    elif num_layers == 2:
        feats_a, avg_ref = scratch
        feats_b = None                     # the last layer never stores features
    else:
        feats_a, feats_b, avg_ref = scratch

    def layer_body(src, dst_ref):
        # adj row tile: sliced out of the resident block, or the streamed tile.
        adj_tile = adj_ref[pl.ds(row0, tm), :] if adj_resident else adj_ref[...]
        # (adj_tile @ feats) @ W  ==  adj_tile @ (feats @ W)   (associativity)
        t = jnp.dot(adj_tile, src, preferred_element_type=jnp.float32,
                    precision=prec)                              # (tm, Dp) f32
        f = jnp.dot(t.astype(cdt), w_ref[0],
                    preferred_element_type=jnp.float32,
                    precision=prec)                              # (tm, Dp) f32
        if dst_ref is not None:
            @pl.when(l < num_layers - 1)   # last layer's features are never read
            def _store_features():
                dst_ref[pl.ds(row0, tm), :] = f.astype(cdt)
        # F.normalize(f, p=2, dim=1, eps=1e-12) == f * rsqrt(max(|f|^2, 1e-24))
        ss = jnp.sum(f * f, axis=-1, keepdims=True)
        contrib = (f * jax.lax.rsqrt(jnp.maximum(ss, 1e-24))) * inv_k
        if num_layers == 1:
            out_ref[...] = contrib
        else:
            @pl.when(l == 0)
            def _init_avg():
                avg_ref[pl.ds(row0, tm), :] = contrib

            @pl.when(jnp.logical_and(l > 0, l < num_layers - 1))
            def _accumulate_avg():
                avg_ref[pl.ds(row0, tm), :] = avg_ref[pl.ds(row0, tm), :] + contrib

            @pl.when(l == num_layers - 1)
            def _write_out():                                    # only final layer
                out_ref[...] = avg_ref[pl.ds(row0, tm), :] + contrib

    @pl.when(l == 0)
    def _layer0():                         # reads the resident feats0 input
        layer_body(feats0_ref[...], feats_a)

    if num_layers >= 2:
        @pl.when(jnp.logical_and(l >= 1, l % 2 == 1))
        def _odd_layer():                  # odd layers read A, write B
            layer_body(feats_a[...], feats_b)

    if num_layers >= 3:
        @pl.when(jnp.logical_and(l >= 2, l % 2 == 0))
        def _even_layer():                 # even layers (>= 2) read B, write A
            layer_body(feats_b[...], feats_a)


def sessconv(adj, seqEmbs, seqLens, weights, *,
             compute_dtype=jnp.bfloat16, tm=None, adj_resident=None):
    """SessConv forward.

    adj:      (N, N)        dense session graph
    seqEmbs:  (N, L, D)     item-sequence embeddings
    seqLens:  (N, 1)        sequence lengths
    weights:  (num_layers, D, D), PRE-TRANSPOSED: Linear_i(x) == x @ weights[i]
              (i.e. pass torch_linear.weight.T per layer)
    compute_dtype: MXU dtype for adj / features / W.  Default bf16 on every TPU
              generation (the kernel is HBM-BW bound on adj); accumulation,
              normalization and the running average stay f32.  Pass
              jnp.float32 for a near-exact (Precision.HIGHEST) path.
    tm:       adj row-tile size (multiple of 16); auto-chosen if None.
    adj_resident: force/forbid the VMEM-resident adj fast path (auto if None).
    Returns (N, D) float32 avgFeats.
    """
    num_layers, D, _ = weights.shape
    N = adj.shape[0]
    f32 = jnp.float32
    csz = jnp.dtype(compute_dtype).itemsize
    Dp = _round_up(D, 128)

    # Hoisted pass 0 (trivial, BW-bound): features = sum(seqEmbs, 1) / seqLens.
    feats0 = jnp.sum(seqEmbs.astype(f32), axis=1) / seqLens.astype(f32)   # (N, D)

    vmem_limit = _vmem_limit_bytes()
    tm, Np, resident_auto = _choose_tiling(N, Dp, csz, num_layers,
                                           budget=vmem_limit - (4 << 20), tm=tm)
    if adj_resident is None:
        adj_resident = resident_auto
    num_tiles = Np // tm

    # Zero padding is exact: padded rows/cols stay zero and padded feature
    # columns do not change the per-row L2 norm.
    adj_p = jnp.zeros((Np, Np), compute_dtype).at[:N, :N].set(
        adj.astype(compute_dtype))
    f0_p = jnp.zeros((Np, Dp), compute_dtype).at[:N, :D].set(
        feats0.astype(compute_dtype))
    w_p = jnp.zeros((num_layers, Dp, Dp), compute_dtype).at[:, :D, :D].set(
        weights.astype(compute_dtype))

    if adj_resident:
        # Fetched once (constant block index), reused by every layer / tile.
        adj_spec = pl.BlockSpec((Np, Np), lambda l, i: (0, 0))
    else:
        # Streamed (tm, Np) row tiles, double-buffered by the pipeline.
        adj_spec = pl.BlockSpec((tm, Np), lambda l, i: (i, 0))
    f0_spec = pl.BlockSpec((Np, Dp), lambda l, i: (0, 0))          # resident
    w_spec = pl.BlockSpec((1, Dp, Dp), lambda l, i: (l, 0, 0))
    # Output block index is pinned to 0 until the final layer -> exactly one
    # HBM writeback per row tile (during the final layer).
    last = num_layers - 1
    out_spec = pl.BlockSpec((tm, Dp),
                            lambda l, i: (jnp.where(l == last, i, 0), 0))

    if num_layers == 1:
        scratch = []
    elif num_layers == 2:
        scratch = [pltpu.VMEM((Np, Dp), compute_dtype),     # feats A
                   pltpu.VMEM((Np, Dp), f32)]                # running average
    else:
        scratch = [pltpu.VMEM((Np, Dp), compute_dtype),     # feats A
                   pltpu.VMEM((Np, Dp), compute_dtype),     # feats B
                   pltpu.VMEM((Np, Dp), f32)]                # running average

    kernel = functools.partial(sessconv_kernel, num_layers=num_layers, tm=tm,
                               adj_resident=adj_resident)
    out_p = pl.pallas_call(
        kernel,
        out_shape=jax.ShapeDtypeStruct((Np, Dp), f32),
        grid_spec=pltpu.PrefetchScalarGridSpec(
            num_scalar_prefetch=0,
            grid=(num_layers, num_tiles),
            in_specs=[adj_spec, f0_spec, w_spec],
            out_specs=out_spec,
            scratch_shapes=scratch,
        ),
        compiler_params=pltpu.CompilerParams(
            # Both axes must stay 'arbitrary': each layer reads the FULL
            # feature matrix produced by the previous layer from per-core VMEM
            # scratch, so neither axis may be megacore-sharded.
            # TODO(synk): v7x dual-TC split of the row axis via core_map with a
            # per-layer exchange of the newly written feature halves.
            dimension_semantics=("arbitrary", "arbitrary"),
            vmem_limit_bytes=vmem_limit,
        ),
    )(adj_p, f0_p, w_p)

    # Add back the hoisted init term exactly in f32:  avg0 = feats0 / (k + 1).
    return out_p[:N, :D] + feats0 / (num_layers + 1)


def sessconv_ref(adj, seqEmbs, seqLens, weights):
    """Pure-JAX reference matching the PyTorch forward."""
    hi = jax.lax.Precision.HIGHEST
    feats = jnp.sum(seqEmbs, axis=1) / seqLens
    k = weights.shape[0]
    avg = feats / (k + 1)
    for i in range(k):
        feats = jnp.matmul(feats, weights[i], precision=hi)
        feats = jnp.matmul(adj, feats, precision=hi)
        nrm = jnp.maximum(
            jnp.sqrt(jnp.sum(feats * feats, axis=1, keepdims=True)), 1e-12)
        avg = avg + (feats / nrm) / (k + 1)
    return avg


if __name__ == "__main__":
    # ---- small shapes consistent with the module ----------------------------
    N, L, D, num_layers = 8, 8, 32, 2
    key = jax.random.PRNGKey(0)
    k1, k2, k3, k4 = jax.random.split(key, 4)
    seqEmbs = jax.random.normal(k1, (N, L, D), dtype=jnp.float32)
    seqLens = jax.random.randint(k2, (N, 1), 1, L + 1).astype(jnp.float32)
    adj = jax.random.uniform(k3, (N, N), dtype=jnp.float32)
    bound = 1.0 / (D ** 0.5)
    # nn.Linear weights stored pre-transposed: Linear_i(x) == x @ weights[i]
    weights = jax.random.uniform(k4, (num_layers, D, D), dtype=jnp.float32,
                                 minval=-bound, maxval=bound)
    ref = sessconv_ref(adj, seqEmbs, seqLens, weights)

    # f32 path (HIGHEST-precision MXU): near-exact.
    out_f32 = jax.block_until_ready(
        sessconv(adj, seqEmbs, seqLens, weights, compute_dtype=jnp.float32))
    assert out_f32.shape == (N, D)
    assert jnp.allclose(out_f32, ref, atol=2e-5, rtol=2e-5), "f32 mismatch vs reference"

    # Default bf16 path (recommended on all generations) — looser tolerance.
    out_bf16 = jax.block_until_ready(sessconv(adj, seqEmbs, seqLens, weights))
    assert jnp.allclose(out_bf16, ref, atol=5e-2, rtol=5e-2), "bf16 mismatch vs reference"

    # Multi-tile, 3-layer configs: exercise both the VMEM-resident adj fast
    # path and the row-tiled streaming path (plus the ping-pong feature carry).
    N2, L2, D2, nl2 = 384, 4, 32, 3
    j1, j2, j3, j4 = jax.random.split(jax.random.PRNGKey(1), 4)
    seqEmbs2 = jax.random.normal(j1, (N2, L2, D2), dtype=jnp.float32)
    seqLens2 = jax.random.randint(j2, (N2, 1), 1, L2 + 1).astype(jnp.float32)
    adj2 = jax.random.uniform(j3, (N2, N2), dtype=jnp.float32) / N2
    bound2 = 1.0 / (D2 ** 0.5)
    weights2 = jax.random.uniform(j4, (nl2, D2, D2), dtype=jnp.float32,
                                  minval=-bound2, maxval=bound2)
    ref2 = sessconv_ref(adj2, seqEmbs2, seqLens2, weights2)

    out2_res = jax.block_until_ready(
        sessconv(adj2, seqEmbs2, seqLens2, weights2,
                 compute_dtype=jnp.float32, tm=128, adj_resident=True))
    assert out2_res.shape == (N2, D2)
    assert jnp.allclose(out2_res, ref2, atol=2e-4, rtol=2e-4), "resident-adj mismatch"

    out2_str = jax.block_until_ready(
        sessconv(adj2, seqEmbs2, seqLens2, weights2,
                 compute_dtype=jnp.float32, tm=128, adj_resident=False))
    assert jnp.allclose(out2_str, ref2, atol=2e-4, rtol=2e-4), "streamed-adj mismatch"

    out2_bf16 = jax.block_until_ready(
        sessconv(adj2, seqEmbs2, seqLens2, weights2, tm=128, adj_resident=False))
    assert jnp.allclose(out2_bf16, ref2, atol=6e-2, rtol=6e-2), "bf16 streamed mismatch"

    print("KERNEL_OK")
</pallas_src>

<mosaic_0001>
module attributes {stable_mosaic.version = 11 : i64} {
  func.func @sessconv_kernel(%arg0: i32, %arg1: i32, %arg2: memref<16x16xf32, #tpu.memory_space<vmem>>, %arg3: memref<16x128xf32, #tpu.memory_space<vmem>>, %arg4: memref<1x128x128xf32, #tpu.memory_space<vmem>>, %arg5: memref<16x128xf32, #tpu.memory_space<vmem>>, %arg6: memref<16x128xf32, #tpu.memory_space<vmem>>, %arg7: memref<16x128xf32, #tpu.memory_space<vmem>>) attributes {dimension_semantics = [#tpu.dimension_semantics<arbitrary>, #tpu.dimension_semantics<arbitrary>], iteration_bounds = array<i64: 2, 1>, scalar_prefetch = 0 : i64, scratch_operands = 2 : i64, tpu.core_type = #tpu.core_type<tc>, window_params = [{pipeline_mode = #tpu.pipeline_mode<synchronous>, transform_indices = @transform_0, window_bounds = array<i64: 16, 16>}, {pipeline_mode = #tpu.pipeline_mode<synchronous>, transform_indices = @transform_1, window_bounds = array<i64: 16, 128>}, {transform_indices = @transform_2, window_bounds = array<i64: 1, 128, 128>}, {transform_indices = @transform_3, window_bounds = array<i64: 16, 128>}]} {
    %c16_i32 = arith.constant 16 : i32
    %0 = arith.muli %arg1, %c16_i32 : i32
    %1 = tpu.assume_multiple %0, 16 : i32
    %c0_i32 = arith.constant 0 : i32
    %2 = arith.cmpi eq, %arg0, %c0_i32 : i32
    %3 = arith.extui %2 : i1 to i32
    %c0_i32_0 = arith.constant 0 : i32
    %4 = arith.cmpi ne, %3, %c0_i32_0 : i32
    scf.if %4 {
      %c0 = arith.constant 0 : index
      %c0_8 = arith.constant 0 : index
      %20 = vector.load %arg3[%c0, %c0_8] : memref<16x128xf32, #tpu.memory_space<vmem>>, vector<16x128xf32>
      %21 = arith.index_cast %1 : i32 to index
      %c0_9 = arith.constant 0 : index
      %22 = vector.load %arg2[%21, %c0_9] : memref<16x16xf32, #tpu.memory_space<vmem>>, vector<16x16xf32>
      %cst = arith.constant dense<0.000000e+00> : vector<16x128xf32>
      %23 = tpu.matmul %22, %20, %cst {dimension_numbers = #tpu.dot_dimension_numbers<[1], [0], [0], [1], [0, 0, 1, 1], [], []>, precision = #tpu.contract_precision<fp32>} : vector<16x16xf32>, vector<16x128xf32>, vector<16x128xf32> -> vector<16x128xf32>
      %c0_10 = arith.constant 0 : index
      %c0_11 = arith.constant 0 : index
      %c0_12 = arith.constant 0 : index
      %24 = vector.load %arg4[%c0_10, %c0_11, %c0_12] : memref<1x128x128xf32, #tpu.memory_space<vmem>>, vector<1x128x128xf32>
      %25 = vector.shape_cast %24 : vector<1x128x128xf32> to vector<128x128xf32>
      %cst_13 = arith.constant dense<0.000000e+00> : vector<16x128xf32>
      %26 = tpu.matmul %23, %25, %cst_13 {dimension_numbers = #tpu.dot_dimension_numbers<[1], [0], [0], [1], [0, 0, 1, 1], [], []>, precision = #tpu.contract_precision<fp32>} : vector<16x128xf32>, vector<128x128xf32>, vector<16x128xf32> -> vector<16x128xf32>
      %c1_i32_14 = arith.constant 1 : i32
      %27 = arith.cmpi slt, %arg0, %c1_i32_14 : i32
      %28 = arith.extui %27 : i1 to i32
      %c0_i32_15 = arith.constant 0 : i32
      %29 = arith.cmpi ne, %28, %c0_i32_15 : i32
      scf.if %29 {
        %51 = arith.index_cast %1 : i32 to index
        %c0_26 = arith.constant 0 : index
        %52 = vector.load %arg6[%51, %c0_26] : memref<16x128xf32, #tpu.memory_space<vmem>>, vector<16x128xf32>
        tpu.vector_store %arg6[%51, %c0_26], %26 {strides = array<i32>} : memref<16x128xf32, #tpu.memory_space<vmem>>, vector<16x128xf32>,
      } else {
      }
      %30 = arith.mulf %26, %26 : vector<16x128xf32>
      %cst_16 = arith.constant dense<0.000000e+00> : vector<16xf32>
      %31 = vector.multi_reduction <add>, %30, %cst_16 [1] : vector<16x128xf32> to vector<16xf32>
      %32 = vector.shape_cast %31 : vector<16xf32> to vector<16x1xf32>
      %cst_17 = arith.constant 1.000000e-24 : f32
      %33 = vector.broadcast %cst_17 : f32 to vector<16x1xf32>
      %34 = arith.maximumf %32, %33 : vector<16x1xf32>
      %35 = math.rsqrt %34 : vector<16x1xf32>
      %36 = vector.broadcast %35 : vector<16x1xf32> to vector<16x128xf32>
      %37 = arith.mulf %26, %36 : vector<16x128xf32>
      %cst_18 = arith.constant 0.333333343 : f32
      %38 = vector.broadcast %cst_18 : f32 to vector<16x128xf32>
      %39 = arith.mulf %37, %38 : vector<16x128xf32>
      %c0_i32_19 = arith.constant 0 : i32
      %40 = arith.cmpi eq, %arg0, %c0_i32_19 : i32
      %41 = arith.extui %40 : i1 to i32
      %c0_i32_20 = arith.constant 0 : i32
      %42 = arith.cmpi ne, %41, %c0_i32_20 : i32
      scf.if %42 {
        %51 = arith.index_cast %1 : i32 to index
        %c0_26 = arith.constant 0 : index
        %52 = vector.load %arg7[%51, %c0_26] : memref<16x128xf32, #tpu.memory_space<vmem>>, vector<16x128xf32>
        tpu.vector_store %arg7[%51, %c0_26], %39 {strides = array<i32>} : memref<16x128xf32, #tpu.memory_space<vmem>>, vector<16x128xf32>,
      } else {
      }
      %c0_i32_21 = arith.constant 0 : i32
      %43 = arith.cmpi sgt, %arg0, %c0_i32_21 : i32
      %c1_i32_22 = arith.constant 1 : i32
      %44 = arith.cmpi slt, %arg0, %c1_i32_22 : i32
      %45 = arith.andi %43, %44 : i1
      %46 = arith.extui %45 : i1 to i32
      %c0_i32_23 = arith.constant 0 : i32
      %47 = arith.cmpi ne, %46, %c0_i32_23 : i32
      scf.if %47 {
        %51 = arith.index_cast %1 : i32 to index
        %c0_26 = arith.constant 0 : index
        %52 = vector.load %arg7[%51, %c0_26] : memref<16x128xf32, #tpu.memory_space<vmem>>, vector<16x128xf32>
        %53 = arith.addf %52, %39 : vector<16x128xf32>
        %54 = arith.index_cast %1 : i32 to index
        %c0_27 = arith.constant 0 : index
        %55 = vector.load %arg7[%54, %c0_27] : memref<16x128xf32, #tpu.memory_space<vmem>>, vector<16x128xf32>
        tpu.vector_store %arg7[%54, %c0_27], %53 {strides = array<i32>} : memref<16x128xf32, #tpu.memory_space<vmem>>, vector<16x128xf32>,
      } else {
      }
      %c1_i32_24 = arith.constant 1 : i32
      %48 = arith.cmpi eq, %arg0, %c1_i32_24 : i32
      %49 = arith.extui %48 : i1 to i32
      %c0_i32_25 = arith.constant 0 : i32
      %50 = arith.cmpi ne, %49, %c0_i32_25 : i32
      scf.if %50 {
        %51 = arith.index_cast %1 : i32 to index
        %c0_26 = arith.constant 0 : index
        %52 = vector.load %arg7[%51, %c0_26] : memref<16x128xf32, #tpu.memory_space<vmem>>, vector<16x128xf32>
        %53 = arith.addf %52, %39 : vector<16x128xf32>
        %c0_27 = arith.constant 0 : index
        %c0_28 = arith.constant 0 : index
        %54 = vector.load %arg5[%c0_27, %c0_28] : memref<16x128xf32, #tpu.memory_space<vmem>>, vector<16x128xf32>
        tpu.vector_store %arg5[%c0_27, %c0_28], %53 {strides = array<i32>} : memref<16x128xf32, #tpu.memory_space<vmem>>, vector<16x128xf32>,
      } else {
      }
    } else {
    }
    %c1_i32 = arith.constant 1 : i32
    %5 = arith.cmpi sge, %arg0, %c1_i32 : i32
    %c2_i32 = arith.constant 2 : i32
    %c0_i32_1 = arith.constant 0 : i32
    %6 = arith.cmpi eq, %c2_i32, %c0_i32_1 : i32
    %c1_i32_2 = arith.constant 1 : i32
    %7 = arith.select %6, %c1_i32_2, %c2_i32 : i32
    %8 = arith.remsi %arg0, %7 : i32
    %c0_i32_3 = arith.constant 0 : i32
    %9 = arith.cmpi ne, %8, %c0_i32_3 : i32
    %c0_i32_4 = arith.constant 0 : i32
    %10 = arith.cmpi slt, %8, %c0_i32_4 : i32
    %c0_i32_5 = arith.constant 0 : i32
    %11 = arith.cmpi slt, %7, %c0_i32_5 : i32
    %12 = arith.xori %10, %11 : i1
    %13 = arith.andi %12, %9 : i1
    %14 = arith.addi %8, %7 : i32
    %15 = arith.select %13, %14, %8 : i32
    %c1_i32_6 = arith.constant 1 : i32
    %16 = arith.cmpi eq, %15, %c1_i32_6 : i32
    %17 = arith.andi %5, %16 : i1
    %18 = arith.extui %17 : i1 to i32
    %c0_i32_7 = arith.constant 0 : i32
    %19 = arith.cmpi ne, %18, %c0_i32_7 : i32
    scf.if %19 {
      %c0 = arith.constant 0 : index
      %c0_8 = arith.constant 0 : index
      %20 = vector.load %arg6[%c0, %c0_8] : memref<16x128xf32, #tpu.memory_space<vmem>>, vector<16x128xf32>
      %21 = arith.index_cast %1 : i32 to index
      %c0_9 = arith.constant 0 : index
      %22 = vector.load %arg2[%21, %c0_9] : memref<16x16xf32, #tpu.memory_space<vmem>>, vector<16x16xf32>
      %cst = arith.constant dense<0.000000e+00> : vector<16x128xf32>
      %23 = tpu.matmul %22, %20, %cst {dimension_numbers = #tpu.dot_dimension_numbers<[1], [0], [0], [1], [0, 0, 1, 1], [], []>, precision = #tpu.contract_precision<fp32>} : vector<16x16xf32>, vector<16x128xf32>, vector<16x128xf32> -> vector<16x128xf32>
      %c0_10 = arith.constant 0 : index
      %c0_11 = arith.constant 0 : index
      %c0_12 = arith.constant 0 : index
      %24 = vector.load %arg4[%c0_10, %c0_11, %c0_12] : memref<1x128x128xf32, #tpu.memory_space<vmem>>, vector<1x128x128xf32>
      %25 = vector.shape_cast %24 : vector<1x128x128xf32> to vector<128x128xf32>
      %cst_13 = arith.constant dense<0.000000e+00> : vector<16x128xf32>
      %26 = tpu.matmul %23, %25, %cst_13 {dimension_numbers = #tpu.dot_dimension_numbers<[1], [0], [0], [1], [0, 0, 1, 1], [], []>, precision = #tpu.contract_precision<fp32>} : vector<16x128xf32>, vector<128x128xf32>, vector<16x128xf32> -> vector<16x128xf32>
      %27 = arith.mulf %26, %26 : vector<16x128xf32>
      %cst_14 = arith.constant dense<0.000000e+00> : vector<16xf32>
      %28 = vector.multi_reduction <add>, %27, %cst_14 [1] : vector<16x128xf32> to vector<16xf32>
      %29 = vector.shape_cast %28 : vector<16xf32> to vector<16x1xf32>
      %cst_15 = arith.constant 1.000000e-24 : f32
      %30 = vector.broadcast %cst_15 : f32 to vector<16x1xf32>
      %31 = arith.maximumf %29, %30 : vector<16x1xf32>
      %32 = math.rsqrt %31 : vector<16x1xf32>
      %33 = vector.broadcast %32 : vector<16x1xf32> to vector<16x128xf32>
      %34 = arith.mulf %26, %33 : vector<16x128xf32>
      %cst_16 = arith.constant 0.333333343 : f32
      %35 = vector.broadcast %cst_16 : f32 to vector<16x128xf32>
      %36 = arith.mulf %34, %35 : vector<16x128xf32>
      %c0_i32_17 = arith.constant 0 : i32
      %37 = arith.cmpi eq, %arg0, %c0_i32_17 : i32
      %38 = arith.extui %37 : i1 to i32
      %c0_i32_18 = arith.constant 0 : i32
      %39 = arith.cmpi ne, %38, %c0_i32_18 : i32
      scf.if %39 {
        %48 = arith.index_cast %1 : i32 to index
        %c0_24 = arith.constant 0 : index
        %49 = vector.load %arg7[%48, %c0_24] : memref<16x128xf32, #tpu.memory_space<vmem>>, vector<16x128xf32>
        tpu.vector_store %arg7[%48, %c0_24], %36 {strides = array<i32>} : memref<16x128xf32, #tpu.memory_space<vmem>>, vector<16x128xf32>,
      } else {
      }
      %c0_i32_19 = arith.constant 0 : i32
      %40 = arith.cmpi sgt, %arg0, %c0_i32_19 : i32
      %c1_i32_20 = arith.constant 1 : i32
      %41 = arith.cmpi slt, %arg0, %c1_i32_20 : i32
      %42 = arith.andi %40, %41 : i1
      %43 = arith.extui %42 : i1 to i32
      %c0_i32_21 = arith.constant 0 : i32
      %44 = arith.cmpi ne, %43, %c0_i32_21 : i32
      scf.if %44 {
        %48 = arith.index_cast %1 : i32 to index
        %c0_24 = arith.constant 0 : index
        %49 = vector.load %arg7[%48, %c0_24] : memref<16x128xf32, #tpu.memory_space<vmem>>, vector<16x128xf32>
        %50 = arith.addf %49, %36 : vector<16x128xf32>
        %51 = arith.index_cast %1 : i32 to index
        %c0_25 = arith.constant 0 : index
        %52 = vector.load %arg7[%51, %c0_25] : memref<16x128xf32, #tpu.memory_space<vmem>>, vector<16x128xf32>
        tpu.vector_store %arg7[%51, %c0_25], %50 {strides = array<i32>} : memref<16x128xf32, #tpu.memory_space<vmem>>, vector<16x128xf32>,
      } else {
      }
      %c1_i32_22 = arith.constant 1 : i32
      %45 = arith.cmpi eq, %arg0, %c1_i32_22 : i32
      %46 = arith.extui %45 : i1 to i32
      %c0_i32_23 = arith.constant 0 : i32
      %47 = arith.cmpi ne, %46, %c0_i32_23 : i32
      scf.if %47 {
        %48 = arith.index_cast %1 : i32 to index
        %c0_24 = arith.constant 0 : index
        %49 = vector.load %arg7[%48, %c0_24] : memref<16x128xf32, #tpu.memory_space<vmem>>, vector<16x128xf32>
        %50 = arith.addf %49, %36 : vector<16x128xf32>
        %c0_25 = arith.constant 0 : index
        %c0_26 = arith.constant 0 : index
        %51 = vector.load %arg5[%c0_25, %c0_26] : memref<16x128xf32, #tpu.memory_space<vmem>>, vector<16x128xf32>
        tpu.vector_store %arg5[%c0_25, %c0_26], %50 {strides = array<i32>} : memref<16x128xf32, #tpu.memory_space<vmem>>, vector<16x128xf32>,
      } else {
      }
    } else {
    }
    return
  }
  func.func @transform_0(%arg0: i32, %arg1: i32) -> (i32, i32) {
    %c0_i32 = arith.constant 0 : i32
    %c0_i32_0 = arith.constant 0 : i32
    %c0_i32_1 = arith.constant 0 : i32
    return %c0_i32, %c0_i32_0 : i32, i32
  }
  func.func @transform_1(%arg0: i32, %arg1: i32) -> (i32, i32) {
    %c0_i32 = arith.constant 0 : i32
    %c0_i32_0 = arith.constant 0 : i32
    %c0_i32_1 = arith.constant 0 : i32
    return %c0_i32, %c0_i32_0 : i32, i32
  }
  func.func @transform_2(%arg0: i32, %arg1: i32) -> (i32, i32, i32) {
    %c0_i32 = arith.constant 0 : i32
    %c0_i32_0 = arith.constant 0 : i32
    %c0_i32_1 = arith.constant 0 : i32
    return %arg0, %c0_i32, %c0_i32_0 : i32, i32, i32
  }
  func.func @transform_3(%arg0: i32, %arg1: i32) -> (i32, i32) {
    %c1_i32 = arith.constant 1 : i32
    %0 = arith.cmpi eq, %arg0, %c1_i32 : i32
    %c0_i32 = arith.constant 0 : i32
    %1 = arith.select %0, %arg1, %c0_i32 : i32
    %c0_i32_0 = arith.constant 0 : i32
    %c0_i32_1 = arith.constant 0 : i32
    return %1, %c0_i32_0 : i32, i32
  }
}

</mosaic_0001>

<bundles_post_ra>
// kernel: tpu_custom_call.1
= control target key start
LH: loop header
LB: loop body
LE: loop exit
PB: predicated region body
PF: predicated region fallthrough
CT: control target
= control target key end

     0   :  { %8 = vsyncpa [#allocation5], 0  ;;  %s5273_s0 = inlined_call_operand.hbm [shape: f32[16,16], index: 0, kind: input, shape index: {}]   ;;  %s5274_s1 = inlined_call_operand.hbm [shape: f32[16,128], index: 1, kind: input, shape index: {}]   ;;  %s5275_s2 = inlined_call_operand.hbm [shape: f32[2,128,128], index: 2, kind: input, shape index: {}]   ;;  %s5276_s3 = inlined_call_operand.hbm [shape: f32[16,128], index: 3, kind: output, shape index: {}]  }
   0x1   :  { %9 = vsyncpa [#allocation8], 0 }
   0x2   :  { %10 = vsyncpa [#allocation6], 0 }
   0x3   :  { %12 = vsyncpa [#allocation6 + $0x1], 0  ;;  %s4475_s12 = smov 0   ;;  %s4477_s13 = smov 0  }
   0x4   :  { %s4479_s14 = smov 0   ;;  %s4481_s15 = smov 0  }
   0x5   :  { %s4483_s16 = smov 0   ;;  %s4485_s17 = smov 0  }
   0x6 LB: > { %s4504_s18 = sadd.s32 4294967295, %s4445_s17   ;;  %s2906_s19 = sadd.s32 4294967294, %s4445_s17   ;;  %s4445_s17 = sphi %s4485_s17, %s18_s17   ;;  %s4441_s16 = sphi %s4483_s16, %s5294_s16   ;;  %s4437_s15 = sphi %s4481_s15, %s5293_s15   ;;  %s4433_s14 = sphi %s4479_s14, %s5292_s14   ;;  %s4429_s13 = sphi %s4477_s13, %s5291_s13   ;;  %s4425_s12 = sphi %s4475_s12, %s5290_s12  }
   0x7   : > { %p86_p0 = scmp.ne.s32.totalorder %s4433_s14, %s4429_s13  ;;  %p87_p1 = scmp.eq.s32.totalorder %s4445_s17, 0 }
   0x8   : > { %p92_p2 = scmp.ne.s32.totalorder %s4429_s13, %s4425_s12  ;;  %p5277_p3 = scmp.eq.s32.totalorder %s4504_s18, 0 }
   0x9   : > { %p88_p4 = por %p87_p1, %p86_p0  ;;  %p2907_p5 = scmp.ge.s32.totalorder %s4445_s17, 1 }
   0xa   : > { %p4515_p6 = por %p5277_p3, %p92_p2  ;;  %p133_p7 = scmp.lt.s32.totalorder %s4445_s17, 3 }
   0xb   : > { %s4447_s22 = smov [#allocation4]   ;;  %p4202_p11 = scmp.lt.s32.totalorder %s4445_s17, 2 }
   0xc   : > { %s5279_s20 = scalar_select %p4515_p6, 1, 0 }
   0xd   : > { %p4520_p8 = pnand %p2907_p5, %p133_p7  ;;  %s145_s23 = sshll.u32 %s4447_s22, 4  ;;  %s4524_s23 = int_to_ptr.vmem [resolvable:$true] %s145_s23 }
   0xe   : > { %p4536_p13 = pnand %p4202_p11, %p88_p4  ;;  %s4448_s26 = smov [#allocation7]  }
   0xf   : > { %p4185_p9 = pneg %p4520_p8  ;;  %s158_s27 = sshll.u32 %s4448_s26, 4  ;;  %s4540_s27 = int_to_ptr.vmem [resolvable:$true] %s158_s27 }
  0x10   : > { %s4271_s30 = scalar_lea.hbm %s5273_s0, 256 }
  0x11   : > { %p4532_p12 = pnand %p4185_p9, %p5277_p3  ;;  %p4272_p0 = scmp.ne.s32.totalorder %s5273_s0, %s4271_s30 }
  0x12   : > { %p4278_p5 = scmp.lt.u32.totalorder %s4271_s30, %s5273_s0 }
  0x13   : > { %p4273_p1 = pneg %p4532_p12 }
  0x15   : > { %p4274_p2 = pnand %p4273_p1, %p4272_p0 }
  0x17   : > { %p4275_p4 = pneg %p4274_p2 }
  0x19   : > { %p4280_p7 = pnand %p4278_p5, %p4275_p4 }
  0x1b   : > { %4283 = shalt.err (!%p4280_p7)
}
  0x1c   : > { %s4284_s8 = scalar_lea.vmem %s4524_s23, 256  ;;  %p4292_p3 = scmp.lt.s32.totalorder %s4524_s23, %s4524_s23 }
  0x1d   : > { %p4285_p9 = scmp.ne.s32.totalorder %s4524_s23, %s4284_s8  ;;  %p4293_p0 = scmp.lt.s32.totalorder %s4284_s8, %s4284_s8 }
  0x1f   : > { %p4287_p11 = pnand %p4285_p9, %p4273_p1  ;;  %p4294_p2 = por %p4293_p0, %p4292_p3 }
  0x21   : > { %p4288_p10 = pneg %p4287_p11 }
  0x23   : > { %p4295_p6 = pnand %p4294_p2, %p4288_p10 }
  0x25   : > { %4298 = shalt.err (!%p4295_p6)
}
  0x26   : > { %s4449_s9 = smov 128   ;;  %s4450_s10 = smov 8  }
  0x27   : > { %4188 = dma.hbm_to_vmem [thread:$0]  (!%p4532_p12), %s5273_s0, 256, %s4524_s23, [#allocation5], %s4449_s9, %s4449_s9, %s4450_s10  }
  0x28   : > { %s4299_s28 = scalar_lea.hbm %s5274_s1, 256 }
  0x29   : > { %p4300_p3 = scmp.ne.s32.totalorder %s5274_s1, %s4299_s28  ;;  %p4306_p4 = scmp.lt.u32.totalorder %s4299_s28, %s5274_s1 }
  0x2b   : > { %p4302_p6 = pnand %p4300_p3, %p4273_p1 }
  0x2d   : > { %p4303_p10 = pneg %p4302_p6 }
  0x2f   : > { %p4308_p5 = pnand %p4306_p4, %p4303_p10 }
  0x31   : > { %4311 = shalt.err (!%p4308_p5)
}
  0x32   : > { %s4312_s23 = scalar_lea.vmem %s4540_s27, 256  ;;  %p4320_p0 = scmp.lt.s32.totalorder %s4540_s27, %s4540_s27 }
  0x33   : > { %p4313_p7 = scmp.ne.s32.totalorder %s4540_s27, %s4312_s23  ;;  %p4321_p2 = scmp.lt.s32.totalorder %s4312_s23, %s4312_s23 }
  0x35   : > { %p4315_p9 = pnand %p4313_p7, %p4273_p1  ;;  %p4322_p3 = por %p4321_p2, %p4320_p0 }
  0x37   : > { %p4316_p11 = pneg %p4315_p9 }
  0x39   : > { %p4323_p6 = pnand %p4322_p3, %p4316_p11 }
  0x3b   : > { %4326 = shalt.err (!%p4323_p6)
}
  0x3c   : > { %4191 = dma.hbm_to_vmem [thread:$0]  (!%p4532_p12), %s5274_s1, 256, %s4540_s27, [#allocation8], %s4449_s9, %s4449_s9, %s4450_s10  }
  0x3d   : > { %s79_s8 = sadd.s32 1, %s4433_s14  ;;  %s30_s11 = sadd.s32 1, %s4441_s16 }
  0x3e   : > { %s172_s12 = sand.u32 1, %s4445_s17   ;;  %p32_p1 = scmp.ge.s32.totalorder %s30_s11, 2 }
  0x3f   : > { %s174_s24 = sand.u32 1, %s4433_s14   ;;  %s2930_s22 = sshll.u32 %s4441_s16, 11 }
  0x40   : > { %s5296_s11 = smov (%p32_p1, %s30_s11), 0  ;;  %s2911_s26 = sshll.u32 %s174_s24, 7 }
  0x41   : > { %s4610_s30 = scalar_lea.hbm %s5275_s2, %s2930_s22  ;;  %s76_s27 = ssub.s32 %s4441_s16, %s5296_s11 }
  0x42   : > { %p77_p12 = scmp.eq.s32.totalorder %s76_s27, 0  ;;  %s176_s4 = scalar_lea.vmem [#allocation9], %s2911_s26 }
  0x43   : > { %s183_s5 = sshll.u32 %s176_s4, 4  ;;  %s4619_s6 = scalar_lea.sflag [#allocation5], %s172_s12  ;;  %s4614_s5 = int_to_ptr.vmem [resolvable:$true] %s183_s5 }
  0x44   : > { %s4617_s23 = scalar_select %p77_p12, %s4433_s14, %s79_s8  }
  0x45   : > { %s4327_s7 = scalar_lea.hbm %s4610_s30, 2048  ;;  %p4329_p4 = pneg %p4536_p13 }
  0x46   : > { %p4328_p10 = scmp.ne.s32.totalorder %s4610_s30, %s4327_s7  ;;  %s4332_s28 = scalar_lea.hbm %s5275_s2, 4096 }
  0x47   : > { %p4333_p9 = scmp.lt.u32.totalorder %s4610_s30, %s5275_s2  ;;  %p4334_p11 = scmp.lt.u32.totalorder %s4332_s28, %s4327_s7 }
  0x48   : > { %p4330_p5 = pnand %p4329_p4, %p4328_p10  ;;  %p4336_p2 = scmp.lt.u32.totalorder %s4327_s7, %s4610_s30 }
  0x49   : > { %p4335_p0 = por %p4334_p11, %p4333_p9 }
  0x4a   : > { %p4331_p7 = pneg %p4330_p5 }
  0x4b   : > { %p4337_p3 = por %p4336_p2, %p4335_p0 }
  0x4d   : > { %p4338_p6 = pnand %p4337_p3, %p4331_p7 }
  0x4f   : > { %4341 = shalt.err (!%p4338_p6)
}
  0x50   : > { %s4342_s8 = scalar_lea.vmem %s4614_s5, 2048  ;;  %s4451_s12 = smov [#allocation9]  }
  0x51   : > { %p4343_p1 = scmp.ne.s32.totalorder %s4614_s5, %s4342_s8  ;;  %s4347_s27 = sshll.u32 %s4451_s12, 4  ;;  %s4348_s27 = int_to_ptr.vmem [resolvable:$false] %s4347_s27 }
  0x52   : > { %s4349_s4 = scalar_lea.vmem %s4348_s27, 4096  ;;  %p4350_p5 = scmp.lt.s32.totalorder %s4614_s5, %s4348_s27 }
  0x53   : > { %p4345_p12 = pnand %p4343_p1, %p4329_p4  ;;  %p4351_p9 = scmp.lt.s32.totalorder %s4349_s4, %s4342_s8 }
  0x55   : > { %p4346_p10 = pneg %p4345_p12  ;;  %p4352_p11 = por %p4351_p9, %p4350_p5 }
  0x57   : > { %p4353_p0 = pnand %p4352_p11, %p4346_p10 }
  0x59   : > { %4356 = shalt.err (!%p4353_p0)
}
  0x5a   : > { %4195 = dma.hbm_to_vmem [thread:$0]  (!%p4536_p13), %s4610_s30, 2048, %s4614_s5, %s4619_s6, %s4449_s9, %s4449_s9, %s4450_s10  }
  0x5b   : > { %195 = sbr.rel (%p4520_p8) target bundleno = 1585 (0x631), region = 32  ;;  %p5283_p4 = scmp.eq.s32.totalorder (!%p4520_p8), %s4504_s18, 0 }
  0x62   : > { %4408 = dma.done.wait (%p5283_p4), [#allocation5], 256   ;;  %p5284_p7 = pmov %p5283_p4 }
  0x63   : > { %p5285_p2 = pmov %p5283_p4 }
  0x64   : > { %4410 = vsyncadd (%p5284_p7), [#allocation5], 4294967040 }
  0x65   : > { %4412 = dma.done.wait (%p5285_p2), [#allocation8], 256   ;;  %p5286_p3 = pmov %p5285_p2 }
  0x66   : > { %s205_s25 = sand.u32 1, %s4504_s18   ;;  %s207_s9 = sand.u32 1, %s4429_s13  }
  0x67   : > { %4414 = vsyncadd (%p5286_p3), [#allocation8], 4294967040  ;;  %s2917_s10 = sshll.u32 %s207_s9, 7  ;;  %s206_s21 = scalar_lea.sflag [#allocation5], %s205_s25 }
  0x68   : > { %s4662_s30 = scalar_lea.vmem [#allocation9], %s2917_s10  ;;  %p5287_p8 = scmp.ne.s32.totalorder %s5279_s20, 0 }
  0x6a   : > { %4416 = dma.done.wait (%p5287_p8), %s206_s21, 2048  }
  0x6b   : > { %4418 = vsyncadd (%p5287_p8), %s206_s21, 4294965248  ;;  %p2918_p13 = scmp.ne.s32.totalorder %s4437_s15, 0 }
  0x6c   : > { %v240_v0 = vld [vmem:[#allocation7] sm:$0xff] (!%p2918_p13)  ;;  %v241_v1 = vld [vmem:[#allocation7 + $0x8] sm:$0xff] (!%p2918_p13)  ;;  %v243_v2 = vld [vmem:[#allocation4] sm:$0xff] (!%p2918_p13)  ;;  %vm245_vm0 = vcmask (!%p2918_p13), 130048   ;;  %p1454_p6 = scmp.lt.s32.totalorder (!%p2918_p13), %s4437_s15, 1  ;;  %p2919_p1 = scmp.ge.s32.totalorder (!%p2918_p13), %s4437_s15, 1 }
  0x6d   : > { %239 = sbr.rel (%p2918_p13) target bundleno = 829 (0x33d), region = 48  ;;  %v253_v3 = vand.u32 (!%p2918_p13), 4294901760, %v240_v0  ;;  %v256_v4 = vand.u32 (!%p2918_p13), 4294901760, %v241_v1  ;;  %v244_v5 = vld [vmem:[#allocation4 + $0x8] sm:$0xff] (!%p2918_p13)  ;;  %v247_v6 = vsel (!%p2918_p13), %vm245_vm0, %v243_v2, 0  ;;  %v4672_v27 = vld [vmem:[%s4662_s30] sm:$0xff] (!%p2918_p13) }
  0x6e   : > { %v250_v7 = vsel (!%p2918_p13), %vm245_vm0, %v244_v5, 0  ;;  %v319_v8 = vand.u32 (!%p2918_p13), 4294901760, %v247_v6  ;;  %v4675_v28 = vld [vmem:[%s4662_s30 + $0x8] sm:$0xff] (!%p2918_p13)  ;;  %v771_v32 = vand.u32 (!%p2918_p13), 4294901760, %v4672_v27  ;;  %v4686_v35 = vld [vmem:[%s4662_s30 + $0x10] sm:$0xff] (!%p2918_p13)  ;;  %v4689_v36 = vld [vmem:[%s4662_s30 + $0x18] sm:$0xff] (!%p2918_p13) }
  0x6f   : > { %v3699_v9 = vpack.c.bf16 (!%p2918_p13), %v256_v4, %v253_v3  ;;  %v329_v10 = vand.u32 (!%p2918_p13), 4294901760, %v250_v7  ;;  %v341_v11 = vsub.f32 (!%p2918_p13), %v240_v0, %v253_v3  ;;  %v348_v12 = vsub.f32 (!%p2918_p13), %v241_v1, %v256_v4  ;;  %v4695_v39 = vld [vmem:[%s4662_s30 + $0x20] sm:$0xff] (!%p2918_p13)  ;;  %v4698_v40 = vld [vmem:[%s4662_s30 + $0x28] sm:$0xff] (!%p2918_p13)  ;;  %v4711_v44 = vld [vmem:[%s4662_s30 + $0x30] sm:$0xff] (!%p2918_p13) }
  0x70   : > { %v320_v13 = vsub.f32 (!%p2918_p13), %v247_v6, %v319_v8  ;;  %v774_v33 = vand.u32 (!%p2918_p13), 4294901760, %v4675_v28  ;;  %v777_v37 = vand.u32 (!%p2918_p13), 4294901760, %v4686_v35  ;;  %v780_v38 = vand.u32 (!%p2918_p13), 4294901760, %v4689_v36  ;;  %v4714_v45 = vld [vmem:[%s4662_s30 + $0x38] sm:$0xff] (!%p2918_p13)  ;;  %v4728_v49 = vld [vmem:[%s4662_s30 + $0x40] sm:$0xff] (!%p2918_p13)  ;;  %v4731_v50 = vld [vmem:[%s4662_s30 + $0x48] sm:$0xff] (!%p2918_p13) }
  0x71   : > { %3712 = vmatprep.subr.bf16.mxu0 (!%p2918_p13), %v3699_v9  ;;  %3700 = vmatprep.subr.bf16.mxu1 (!%p2918_p13), %v3699_v9  ;;  %v330_v14 = vsub.f32 (!%p2918_p13), %v250_v7, %v329_v10  ;;  %v342_v15 = vand.u32 (!%p2918_p13), 4294901760, %v341_v11  ;;  %v349_v16 = vand.u32 (!%p2918_p13), 4294901760, %v348_v12  ;;  %v3707_v31 = vpack.c.bf16 (!%p2918_p13), %v348_v12, %v341_v11  ;;  %v764_v55 = vld [vmem:[%s4662_s30 + $0x50] sm:$0xff] (!%p2918_p13)  ;;  %v765_v56 = vld [vmem:[%s4662_s30 + $0x58] sm:$0xff] (!%p2918_p13)  ;;  %v766_v60 = vld [vmem:[%s4662_s30 + $0x60] sm:$0xff] (!%p2918_p13) }
  0x72   : > { %3714 = vmatpush3.bf16.msra.mxu0 (!%p2918_p13), %v3699_v9  ;;  %v321_v17 = vand.u32 (!%p2918_p13), 4294901760, %v320_v13  ;;  %3702 = vmatpush3.bf16.msra.mxu1 (!%p2918_p13), %v3699_v9  ;;  %v4683_v34 = vpack.c.bf16 (!%p2918_p13), %v774_v33, %v771_v32  ;;  %v4705_v41 = vpack.c.bf16 (!%p2918_p13), %v780_v38, %v777_v37  ;;  %v783_v42 = vand.u32 (!%p2918_p13), 4294901760, %v4695_v39  ;;  %v767_v61 = vld [vmem:[%s4662_s30 + $0x68] sm:$0xff] (!%p2918_p13)  ;;  %v768_v1 = vld [vmem:[%s4662_s30 + $0x70] sm:$0xff] (!%p2918_p13)  ;;  %v769_v2 = vld [vmem:[%s4662_s30 + $0x78] sm:$0xff] (!%p2918_p13) }
  0x73   : > { %v331_v18 = vand.u32 (!%p2918_p13), 4294901760, %v330_v14  ;;  %v343_v19 = vsub.f32 (!%p2918_p13), %v341_v11, %v342_v15  ;;  %v350_v20 = vsub.f32 (!%p2918_p13), %v348_v12, %v349_v16  ;;  %v3715_v21 = vpack.c.bf16 (!%p2918_p13), %v349_v16, %v342_v15 }
  0x74   : > { %3220 = vmatprep.mubr.f32.mxu0 %v321_v17  ;;  %v322_v22 = vsub.f32 %v320_v13, %v321_v17  ;;  %v786_v43 = vand.u32 4294901760, %v4698_v40  ;;  %v789_v47 = vand.u32 4294901760, %v4711_v44  ;;  %v792_v48 = vand.u32 4294901760, %v4714_v45 }
  0x75   : > { %3221 = vmatmul.mubr.f32.vlgmr.msra.gmra.mrb[0].mxu0 %v331_v18  ;;  %v332_v23 = vsub.f32 %v330_v14, %v331_v18  ;;  %v344_v24 = vand.u32 4294901760, %v343_v19  ;;  %v351_v25 = vand.u32 4294901760, %v350_v20  ;;  %3716 = vmatprep.subr.bf16.mxu0 %v3715_v21  ;;  %v795_v52 = vand.u32 4294901760, %v4728_v49 }
  0x76   : > { %v323_v26 = vand.u32 4294901760, %v322_v22  ;;  %3718 = vmatpush3.bf16.msra.mxu0 %v3715_v21  ;;  %3227 = vmatprep.mubr.f32.mxu0 %v319_v8  ;;  %v4721_v46 = vpack.c.bf16 %v786_v43, %v783_v42  ;;  %v4739_v51 = vpack.c.bf16 %v792_v48, %v789_v47  ;;  %v798_v53 = vand.u32 4294901760, %v4731_v50 }
  0x77   : > { %v333_v29 = vand.u32 4294901760, %v332_v23  ;;  %v3703_v30 = vpack.c.bf16 %v351_v25, %v344_v24  ;;  %3720 = vmatprep.subr.bf16.mxu0 %v3699_v9  ;;  %v801_v57 = vand.u32 4294901760, %v764_v55  ;;  %v804_v58 = vand.u32 4294901760, %v765_v56 }
  0x78   : > { %3199 = vmatprep.mubr.f32.mxu1 %v323_v26  ;;  %v4751_v54 = vpack.c.bf16 %v798_v53, %v795_v52  ;;  %v807_v62 = vand.u32 4294901760, %v766_v60  ;;  %v810_v63 = vand.u32 4294901760, %v767_v61  ;;  %v813_v3 = vand.u32 4294901760, %v768_v1 }
  0x79   : > { %3200 = vmatmul.mubr.f32.vlgmr.msra.gmra.mrb[0].mxu1 %v333_v29  ;;  %3704 = vmatprep.subr.bf16.mxu1 %v3703_v30  ;;  %v4763_v59 = vpack.c.bf16 %v804_v58, %v801_v57  ;;  %v816_v4 = vand.u32 4294901760, %v769_v2  ;;  %v873_v6 = vsub.f32 %v4672_v27, %v771_v32  ;;  %v880_v7 = vsub.f32 %v4675_v28, %v774_v33 }
  0x7a   : > { %3706 = vmatpush3.bf16.msra.mxu1 %v3703_v30  ;;  %3206 = vmatprep.mubr.f32.mxu1 %v319_v8  ;;  %v4771_v0 = vpack.c.bf16 %v810_v63, %v807_v62  ;;  %v943_v16 = vsub.f32 %v764_v55, %v801_v57  ;;  %v950_v17 = vsub.f32 %v765_v56, %v804_v58 }
  0x7b   : > { %3708 = vmatprep.subr.bf16.mxu1 %v3707_v31  ;;  %v4779_v5 = vpack.c.bf16 %v816_v4, %v813_v3  ;;  %v957_v23 = vsub.f32 %v766_v60, %v807_v62  ;;  %v964_v24 = vsub.f32 %v767_v61, %v810_v63  ;;  %v978_v32 = vsub.f32 %v769_v2, %v816_v4 }
  0x7c   : > { %v944_v18 = vand.u32 4294901760, %v943_v16  ;;  %v951_v19 = vand.u32 4294901760, %v950_v17  ;;  %v4820_v4 = vsub.f32 %v4686_v35, %v777_v37  ;;  %v4837_v35 = vsub.f32 %v4698_v40, %v786_v43 }
  0x7d   : > { %3228 = vmatmul.mubr.f32.vlgmr.msra.gmra.mrb[0].mxu0 %v329_v10  ;;  %v958_v27 = vand.u32 4294901760, %v957_v23  ;;  %v965_v28 = vand.u32 4294901760, %v964_v24  ;;  %v979_v58 = vand.u32 4294901760, %v978_v32  ;;  %v4813_v2 = vpack.c.bf16 %v964_v24, %v957_v23 }
  0x7e   : > { %3722 = vmatpush3.bf16.msra.mxu0 %v3699_v9  ;;  %3234 = vmatprep.mubr.f32.mxu0 %v319_v8  ;;  %v874_v8 = vand.u32 4294901760, %v873_v6  ;;  %v881_v9 = vand.u32 4294901760, %v880_v7  ;;  %v4797_v20 = vpack.c.bf16 %v951_v19, %v944_v18  ;;  %v945_v21 = vsub.f32 %v943_v16, %v944_v18 }
  0x7f   : > { %3724 = vmatprep.subr.bf16.mxu0 %v4683_v34  ;;  %v952_v22 = vsub.f32 %v950_v17, %v951_v19  ;;  %v959_v30 = vsub.f32 %v957_v23, %v958_v27  ;;  %v4801_v33 = vpack.c.bf16 %v965_v28, %v958_v27  ;;  %v966_v55 = vsub.f32 %v964_v24, %v965_v28 }
  0x80   : > { %v875_v11 = vsub.f32 %v873_v6, %v874_v8  ;;  %v882_v12 = vsub.f32 %v880_v7, %v881_v9  ;;  %v946_v25 = vand.u32 4294901760, %v945_v21  ;;  %v980_v61 = vsub.f32 %v978_v32, %v979_v58 }
  0x81   : > { %3207 = vmatmul.mubr.f32.vlgmr.msra.gmra.mrb[0].mxu1 %v329_v10  ;;  %v953_v26 = vand.u32 4294901760, %v952_v22  ;;  %v960_v56 = vand.u32 4294901760, %v959_v30  ;;  %v4850_v40 = vsub.f32 %v4711_v44, %v789_v47  ;;  %v4858_v43 = vsub.f32 %v4714_v45, %v792_v48 }
  0x82   : > { %3710 = vmatpush3.bf16.msra.mxu1 %v3707_v31  ;;  %3213 = vmatprep.mubr.f32.mxu1 %v320_v13  ;;  %v876_v13 = vand.u32 4294901760, %v875_v11  ;;  %v971_v31 = vsub.f32 %v768_v1, %v813_v3  ;;  %v981_v11 = vand.u32 4294901760, %v980_v61  ;;  %v4811_v1 = vpack.c.bf16 %v950_v17, %v943_v16 }
  0x83   : > { %3820 = vmatprep.subr.bf16.mxu1 %v4683_v34  ;;  %v4799_v29 = vpack.c.bf16 %v953_v26, %v946_v25  ;;  %v4832_v17 = vsub.f32 %v4695_v39, %v783_v42  ;;  %v909_v39 = vand.u32 4294901760, %v4837_v35  ;;  %v923_v45 = vand.u32 4294901760, %v4858_v43 }
  0x84   : > { %v972_v57 = vand.u32 4294901760, %v971_v31  ;;  %v4815_v3 = vpack.c.bf16 %v978_v32, %v971_v31  ;;  %v4873_v48 = vsub.f32 %v4728_v49, %v795_v52 }
  0x85   : > { %3235 = vmatmul.mubr.f32.vlgmr.msra.gmra.mrb[0].mxu0 %v329_v10  ;;  %v4791_v10 = vpack.c.bf16 %v881_v9, %v874_v8  ;;  %v967_v8 = vand.u32 4294901760, %v966_v55  ;;  %v902_v25 = vand.u32 4294901760, %v4832_v17  ;;  %v910_v47 = vsub.f32 %v4837_v35, %v909_v39 }
  0x86   : > { %3726 = vmatpush3.bf16.msra.mxu0 %v4683_v34  ;;  %v4803_v9 = vpack.c.bf16 %v979_v58, %v972_v57  ;;  %v973_v60 = vsub.f32 %v971_v31, %v972_v57  ;;  %v916_v55 = vand.u32 4294901760, %v4850_v40  ;;  %v4878_v57 = vsub.f32 %v4731_v50, %v798_v53 }
  0x87   : > { %3728 = vmatprep.subr.bf16.mxu0 %v4705_v41  ;;  %v4805_v62 = vpack.c.bf16 %v967_v8, %v960_v56  ;;  %v903_v44 = vsub.f32 %v4832_v17, %v902_v25  ;;  %v930_v50 = vand.u32 4294901760, %v4873_v48 }
  0x88   : > { %v974_v63 = vand.u32 4294901760, %v973_v60  ;;  %v917_v49 = vsub.f32 %v4850_v40, %v916_v55  ;;  %v937_v53 = vand.u32 4294901760, %v4878_v57 }
  0x89   : > { %3214 = vmatmul.mubr.f32.vlgmr.msra.gmra.mrb[0].mxu1 %v330_v14  ;;  %v883_v14 = vand.u32 4294901760, %v882_v12  ;;  %v904_v61 = vand.u32 4294901760, %v903_v44 }
  0x8a   : > { %3822 = vmatpush3.bf16.msra.mxu1 %v4683_v34  ;;  %3730 = vmatpush3.bf16.msra.mxu0 %v4705_v41  ;;  %v4807_v12 = vpack.c.bf16 %v981_v11, %v974_v63  ;;  %v911_v63 = vand.u32 4294901760, %v910_v47  ;;  %v924_v11 = vsub.f32 %v4858_v43, %v923_v45 }
  0x8b   : > { %3824 = vmatprep.subr.bf16.mxu1 %v4705_v41  ;;  %3732 = vmatprep.subr.bf16.mxu0 %v4721_v46  ;;  %v4794_v15 = vpack.c.bf16 %v883_v14, %v876_v13  ;;  %v4809_v13 = vpack.c.bf16 %v880_v7, %v873_v6  ;;  %v4825_v14 = vsub.f32 %v4689_v36, %v780_v38  ;;  %v888_v6 = vand.u32 4294901760, %v4820_v4 }
  0x8d   : > { %v895_v7 = vand.u32 4294901760, %v4825_v14  ;;  %v889_v22 = vsub.f32 %v4820_v4, %v888_v6 }
  0x8e   : > { %3826 = vmatpush3.bf16.msra.mxu1 %v4705_v41  ;;  %3734 = vmatpush3.bf16.msra.mxu0 %v4721_v46 }
  0x8f   : > { %3828 = vmatprep.subr.bf16.mxu1 %v4721_v46  ;;  %3736 = vmatprep.subr.bf16.mxu0 %v4739_v51  ;;  %v896_v23 = vsub.f32 %v4825_v14, %v895_v7  ;;  %v3855_v28 = vpack.c.bf16 %v895_v7, %v888_v6  ;;  %v890_v30 = vand.u32 4294901760, %v889_v22  ;;  %v918_v6 = vand.u32 4294901760, %v917_v49 }
  0x90   : > { %v925_v7 = vand.u32 4294901760, %v924_v11 }
  0x91   : > { %v897_v31 = vand.u32 4294901760, %v896_v23 }
  0x92   : > { %3830 = vmatpush3.bf16.msra.mxu1 %v4721_v46  ;;  %3738 = vmatpush3.bf16.msra.mxu0 %v4739_v51 }
  0x93   : > { %3832 = vmatprep.subr.bf16.mxu1 %v4739_v51  ;;  %3740 = vmatprep.subr.bf16.mxu0 %v4751_v54  ;;  %v3759_v8 = vpack.c.bf16 %v897_v31, %v890_v30 }
  0x96   : > { %3834 = vmatpush3.bf16.msra.mxu1 %v4739_v51  ;;  %3742 = vmatpush3.bf16.msra.mxu0 %v4751_v54 }
  0x97   : > { %3836 = vmatprep.subr.bf16.mxu1 %v4751_v54  ;;  %3744 = vmatprep.subr.bf16.mxu0 %v4763_v59 }
  0x9a   : > { %3838 = vmatpush3.bf16.msra.mxu1 %v4751_v54  ;;  %3746 = vmatpush3.bf16.msra.mxu0 %v4763_v59 }
  0x9b   : > { %3840 = vmatprep.subr.bf16.mxu1 %v4763_v59  ;;  %3748 = vmatprep.subr.bf16.mxu0 %v4771_v0 }
  0x9e   : > { %3842 = vmatpush3.bf16.msra.mxu1 %v4763_v59  ;;  %3750 = vmatpush3.bf16.msra.mxu0 %v4771_v0 }
  0x9f   : > { %3844 = vmatprep.subr.bf16.mxu1 %v4771_v0  ;;  %3752 = vmatprep.subr.bf16.mxu0 %v4779_v5 }
  0xa2   : > { %3846 = vmatpush3.bf16.msra.mxu1 %v4771_v0  ;;  %3754 = vmatpush3.bf16.msra.mxu0 %v4779_v5 }
  0xa3   : > { %3848 = vmatprep.subr.bf16.mxu1 %v4779_v5  ;;  %3756 = vmatprep.subr.bf16.mxu0 %v4794_v15 }
  0xa6   : > { %3850 = vmatpush3.bf16.msra.mxu1 %v4779_v5 }
  0xa7   : > { %3852 = vmatprep.subr.bf16.mxu1 %v4791_v10 }
 0x158   : > { %v3236_v18 = vpop.f32.mrb[0].mxu0 }
 0x159   : > { %v744_v19 = vpop.f32.mrb[1].mxu0 }
 0x15c   : > { %v3215_v16 = vpop.f32.mrb[0].mxu1 }
 0x15d   : > { %v4131_v37 = vadd.f32 %v3236_v18, %v3215_v16  ;;  %v498_v36 = vpop.f32.mrb[1].mxu1  ;;  %v3859_v18 = vpack.c.bf16 %v909_v39, %v902_v25  ;;  %v931_v16 = vsub.f32 %v4873_v48, %v930_v50 }
 0x15e   : > { %v4132_v38 = vadd.f32 %v744_v19, %v498_v36  ;;  %v3863_v19 = vpack.c.bf16 %v923_v45, %v916_v55  ;;  %v3767_v36 = vpack.c.bf16 %v925_v7, %v918_v6 }
 0x15f   : > { %v4839_v21 = vand.u32 4294901760, %v4131_v37 }
 0x160   : > { %v4843_v24 = vand.u32 4294901760, %v4132_v38 }
 0x161   : > { %v4853_v42 = vsub.f32 %v4131_v37, %v4839_v21  ;;  %v938_v37 = vsub.f32 %v4878_v57, %v937_v53 }
 0x162   : > { %v4861_v26 = vsub.f32 %v4132_v38, %v4843_v24  ;;  %v3867_v38 = vpack.c.bf16 %v937_v53, %v930_v50 }
 0x163   : > { %v863_v27 = vand.u32 4294901760, %v4853_v42  ;;  %v939_v22 = vand.u32 4294901760, %v938_v37 }
 0x164   : > { %v853_v32 = vand.u32 4294901760, %v4861_v26 }
 0x165   : > { %v864_v56 = vsub.f32 %v4853_v42, %v863_v27 }
 0x166   : > { %3374 = vmatprep.mubr.f32.mxu1 %v853_v32  ;;  %v854_v58 = vsub.f32 %v4861_v26, %v853_v32 }
 0x167   : > { %3375 = vmatmul.mubr.f32.vlgmr.msra.gmra.mrb[2].mxu1 %v863_v27  ;;  %v865_v52 = vand.u32 4294901760, %v864_v56 }
 0x168   : > { %3854 = vmatpush3.bf16.msra.mxu1 %v4791_v10  ;;  %3409 = vmatprep.mubr.f32.mxu1 %v4843_v24  ;;  %v855_v60 = vand.u32 4294901760, %v854_v58  ;;  %v3763_v10 = vpack.c.bf16 %v911_v63, %v904_v61 }
 0x169   : > { %3856 = vmatprep.subr.bf16.mxu1 %v3855_v28 }
 0x16a   : > { %3269 = vmatprep.mubr.f32.mxu0 %v855_v60 }
 0x16b   : > { %3270 = vmatmul.mubr.f32.vlgmr.msra.gmra.mrb[2].mxu0 %v865_v52 }
 0x16c   : > { %3758 = vmatpush3.bf16.msra.mxu0 %v4794_v15  ;;  %3858 = vmatpush3.bf16.msra.mxu1 %v3855_v28  ;;  %v932_v15 = vand.u32 4294901760, %v931_v16 }
 0x16d   : > { %3304 = vmatprep.mubr.f32.mxu0 %v4843_v24  ;;  %3760 = vmatprep.subr.bf16.mxu0 %v3759_v8 }
 0x16e   : > { %3860 = vmatprep.subr.bf16.mxu1 %v3859_v18  ;;  %v3771_v23 = vpack.c.bf16 %v939_v22, %v932_v15 }
 0x170   : > { %3762 = vmatpush3.bf16.msra.mxu0 %v3759_v8  ;;  %3862 = vmatpush3.bf16.msra.mxu1 %v3859_v18 }
 0x171   : > { %3764 = vmatprep.subr.bf16.mxu0 %v3763_v10  ;;  %3864 = vmatprep.subr.bf16.mxu1 %v3863_v19 }
 0x174   : > { %3766 = vmatpush3.bf16.msra.mxu0 %v3763_v10  ;;  %3866 = vmatpush3.bf16.msra.mxu1 %v3863_v19 }
 0x175   : > { %3768 = vmatprep.subr.bf16.mxu0 %v3767_v36  ;;  %3868 = vmatprep.subr.bf16.mxu1 %v3867_v38 }
 0x178   : > { %3770 = vmatpush3.bf16.msra.mxu0 %v3767_v36  ;;  %3870 = vmatpush3.bf16.msra.mxu1 %v3867_v38 }
 0x179   : > { %3772 = vmatprep.subr.bf16.mxu0 %v3771_v23  ;;  %3872 = vmatprep.subr.bf16.mxu1 %v4797_v20 }
 0x17c   : > { %3774 = vmatpush3.bf16.msra.mxu0 %v3771_v23  ;;  %3874 = vmatpush3.bf16.msra.mxu1 %v4797_v20  ;;  %v3791_v20 = vpack.c.bf16 %v4825_v14, %v4820_v4 }
 0x17d   : > { %3776 = vmatprep.subr.bf16.mxu0 %v4799_v29  ;;  %3876 = vmatprep.subr.bf16.mxu1 %v4801_v33 }
 0x180   : > { %3778 = vmatpush3.bf16.msra.mxu0 %v4799_v29  ;;  %3878 = vmatpush3.bf16.msra.mxu1 %v4801_v33  ;;  %v3799_v29 = vpack.c.bf16 %v4858_v43, %v4850_v40 }
 0x181   : > { %3780 = vmatprep.subr.bf16.mxu0 %v4805_v62  ;;  %3880 = vmatprep.subr.bf16.mxu1 %v4803_v9 }
 0x184   : > { %3782 = vmatpush3.bf16.msra.mxu0 %v4805_v62  ;;  %3882 = vmatpush3.bf16.msra.mxu1 %v4803_v9 }
 0x185   : > { %3784 = vmatprep.subr.bf16.mxu0 %v4807_v12  ;;  %3884 = vmatprep.subr.bf16.mxu1 %v4683_v34 }
 0x187   : > { %3410 = vmatmul.mubr.f32.vlgmr.msra.gmra.mrb[2].mxu1 %v4839_v21 }
 0x188   : > { %3786 = vmatpush3.bf16.msra.mxu0 %v4807_v12  ;;  %3886 = vmatpush3.bf16.msra.mxu1 %v4683_v34  ;;  %v3795_v34 = vpack.c.bf16 %v4837_v35, %v4832_v17 }
 0x189   : > { %3444 = vmatprep.mubr.f32.mxu1 %v4843_v24  ;;  %3788 = vmatprep.subr.bf16.mxu0 %v4809_v13 }
 0x18a   : > { %3888 = vmatprep.subr.bf16.mxu1 %v4705_v41 }
 0x18b   : > { %3305 = vmatmul.mubr.f32.vlgmr.msra.gmra.mrb[2].mxu0 %v4839_v21 }
 0x18c   : > { %3790 = vmatpush3.bf16.msra.mxu0 %v4809_v13  ;;  %3339 = vmatprep.mubr.f32.mxu0 %v4861_v26 }
 0x18d   : > { %3890 = vmatpush3.bf16.msra.mxu1 %v4705_v41  ;;  %3792 = vmatprep.subr.bf16.mxu0 %v3791_v20  ;;  %v3803_v41 = vpack.c.bf16 %v4878_v57, %v4873_v48 }
 0x18e   : > { %3892 = vmatprep.subr.bf16.mxu1 %v4721_v46 }
 0x190   : > { %3794 = vmatpush3.bf16.msra.mxu0 %v3791_v20 }
 0x191   : > { %3894 = vmatpush3.bf16.msra.mxu1 %v4721_v46  ;;  %3796 = vmatprep.subr.bf16.mxu0 %v3795_v34 }
 0x192   : > { %3896 = vmatprep.subr.bf16.mxu1 %v4739_v51 }
 0x194   : > { %3798 = vmatpush3.bf16.msra.mxu0 %v3795_v34 }
 0x195   : > { %3898 = vmatpush3.bf16.msra.mxu1 %v4739_v51  ;;  %3800 = vmatprep.subr.bf16.mxu0 %v3799_v29 }
 0x196   : > { %3900 = vmatprep.subr.bf16.mxu1 %v4751_v54 }
 0x198   : > { %3802 = vmatpush3.bf16.msra.mxu0 %v3799_v29 }
 0x199   : > { %3902 = vmatpush3.bf16.msra.mxu1 %v4751_v54  ;;  %3804 = vmatprep.subr.bf16.mxu0 %v3803_v41 }
 0x19a   : > { %3904 = vmatprep.subr.bf16.mxu1 %v4763_v59 }
 0x19c   : > { %3806 = vmatpush3.bf16.msra.mxu0 %v3803_v41 }
 0x19d   : > { %3906 = vmatpush3.bf16.msra.mxu1 %v4763_v59  ;;  %3808 = vmatprep.subr.bf16.mxu0 %v4811_v1 }
 0x19e   : > { %3908 = vmatprep.subr.bf16.mxu1 %v4771_v0 }
 0x1a0   : > { %3810 = vmatpush3.bf16.msra.mxu0 %v4811_v1 }
 0x1a1   : > { %3910 = vmatpush3.bf16.msra.mxu1 %v4771_v0  ;;  %3812 = vmatprep.subr.bf16.mxu0 %v4813_v2 }
 0x1a2   : > { %3912 = vmatprep.subr.bf16.mxu1 %v4779_v5 }
 0x1a4   : > { %3814 = vmatpush3.bf16.msra.mxu0 %v4813_v2 }
 0x1a5   : > { %3914 = vmatpush3.bf16.msra.mxu1 %v4779_v5  ;;  %3816 = vmatprep.subr.bf16.mxu0 %v4815_v3 }
 0x1a8   : > { %3445 = vmatmul.mubr.f32.vlgmr.msra.gmra.mrb[2].mxu1 %v4839_v21  ;;  %3818 = vmatpush3.bf16.msra.mxu0 %v4815_v3 }
 0x1ab   : > { %3340 = vmatmul.mubr.f32.vlgmr.msra.gmra.mrb[2].mxu0 %v4853_v42 }
 0x27a   : > { %1457 = sbr.rel (%p2919_p1) target bundleno = 643 (0x283), region = 52 }
 0x27b   : > { %v3446_v46 = vpop.f32.mrb[2].mxu1 }
 0x27c   : > { %v1444_v51 = vpop.f32.mrb[3].mxu1 }
 0x27e   : > { %v3341_v54 = vpop.f32.mrb[2].mxu0 }
 0x27f   : > { %v4133_v59 = vadd.f32 %v3446_v46, %v3341_v54  ;;  %v1128_v0 = vpop.f32.mrb[3].mxu0 }
 0x280   : > { %v4134_v33 = vadd.f32 %v1444_v51, %v1128_v0 }
 0x281   : > { %1460 = vst [vmem:[#allocation2 + $0x8] sm:$0xff] %v4133_v59 }
 0x282   : > { %1459 = vst [vmem:[#allocation2] sm:$0xff] %v4134_v33 }
 0x283 PF: > { %v1461_v5 = vmul.f32 %v4134_v33, %v4134_v33  ;;  %v1462_v9 = vmul.f32 %v4133_v59, %v4133_v59  ;;  %p1478_p12 = scmp.gt.s32.totalorder %s4437_s15, 0 }
 0x285   : > { %1463 = vadd.xlane.f32.xlu0 %v1461_v5  ;;  %p4946_p10 = pnand %p1478_p12, %p1454_p6 }
 0x289   : > { %1465 = vadd.xlane.f32.xlu0 %v1462_v9 }
 0x312   : > { %v1464_v62 = vpop.xlane.xlu0 %1463 }
 0x313   : > { %v1467_v12 = vmax.f32 %v1464_v62, 1e-24 }
 0x315   : > { %4263 = vrsqrt.f32 %v1467_v12 }
 0x316   : > { %v1466_v13 = vpop.xlane.xlu0 %1465 }
 0x317   : > { %v1468_v1 = vmax.f32 %v1466_v13, 1e-24 }
 0x319   : > { %4265 = vrsqrt.f32 %v1468_v1 }
 0x31f   : > { %v4264_v2 = vpop.eup %4263 }
 0x320   : > { %v1471_v3 = vmul.f32 %v4264_v2, %v4134_v33 }
 0x322   : > { %v1473_v4 = vmul.f32 0.33333334, %v1471_v3  ;;  %1482 = sbr.rel (%p4946_p10) target bundleno = 819 (0x333), region = 56 }
 0x323   : > { %v4266_v14 = vpop.eup %4265 }
 0x324   : > { %1476 = vst [vmem:[#allocation3] sm:$0xff] %v1473_v4  ;;  %v1472_v17 = vmul.f32 %v4266_v14, %v4133_v59 }
 0x326   : > { %v1474_v35 = vmul.f32 0.33333334, %v1472_v17 }
 0x328   : > { %1477 = vst [vmem:[#allocation3 + $0x8] sm:$0xff] %v1474_v35 }
 0x32b   : > { %v1483_v21 = vld [vmem:[#allocation3] sm:$0xff] }
 0x32c   : > { %v1485_v25 = vadd.f32 %v1483_v21, %v1473_v4 }
 0x32e   : > { %1487 = vst [vmem:[#allocation3] sm:$0xff] %v1485_v25 }
 0x32f   : > { %v1484_v24 = vld [vmem:[#allocation3 + $0x8] sm:$0xff] }
 0x330   : > { %v1486_v39 = vadd.f32 %v1484_v24, %v1474_v35 }
 0x332   : > { %1488 = vst [vmem:[#allocation3 + $0x8] sm:$0xff] %v1486_v39 }
 0x333 PF: > { %p2920_p5 = scmp.ne.s32.totalorder %s4437_s15, 1 }
 0x335   : > { %1492 = sbr.rel (%p2920_p5) target bundleno = 829 (0x33d), region = 60  ;;  %v1493_v40 = vld [vmem:[#allocation3] sm:$0xff] (!%p2920_p5) }
 0x336   : > { %v1495_v43 = vadd.f32 (!%p2920_p5), %v1493_v40, %v1473_v4 }
 0x338   : > { %1497 = vst [vmem:[#allocation10] sm:$0xff] (!%p2920_p5), %v1495_v43 }
 0x339   : > { %v1494_v42 = vld [vmem:[#allocation3 + $0x8] sm:$0xff] (!%p2920_p5) }
 0x33a   : > { %v1496_v26 = vadd.f32 (!%p2920_p5), %v1494_v42, %v1474_v35 }
 0x33c   : > { %1498 = vst [vmem:[#allocation10 + $0x8] sm:$0xff] %v1496_v26 }
 0x33d PF: > { %p1500_p9 = scmp.lt.s32.totalorder %s4437_s15, 0  ;;  %s1501_s5 = ssub.s32 0, %s4437_s15 }
 0x33e   : > { %s2921_s6 = smin.u32 %s4437_s15, %s1501_s5  ;;  %p1499_p0 = scmp.ge.s32.totalorder %s4437_s15, 1 }
 0x33f   : > { %s1503_s7 = sand.u32 1, %s2921_s6  }
 0x340   : > { %s1504_s24 = ssub.s32 0, %s1503_s7 }
 0x341   : > { %s5298_s24 = smov (!%p1500_p9, %s1504_s24), %s1503_s7 }
 0x342   : > { %p2923_p11 = scmp.lt.s32.totalorder %s5298_s24, 0  ;;  %s1510_s22 = sadd.s32 2, %s5298_s24 }
 0x344   : > { %s5300_s22 = smov (!%p2923_p11, %s1510_s22), %s5298_s24 }
 0x345   : > { %p1512_p4 = scmp.eq.s32.totalorder %s5300_s22, 1 }
 0x347   : > { %p1513_p7 = pnand %p1512_p4, %p1499_p0 }
 0x348   : > { %v1517_v27 = vld [vmem:[#allocation2] sm:$0xff] (!%p1513_p7)  ;;  %v1518_v28 = vld [vmem:[#allocation2 + $0x8] sm:$0xff] (!%p1513_p7)  ;;  %vm1522_vm1 = vcmask (!%p1513_p7), 130048   ;;  %v4972_v34 = vld [vmem:[%s4662_s30 + $0x10] sm:$0xff] (!%p1513_p7) }
 0x349   : > { %1516 = sbr.rel (%p1513_p7) target bundleno = 1561 (0x619), region = 64  ;;  %v1520_v30 = vld [vmem:[#allocation4] sm:$0xff] (!%p1513_p7)  ;;  %v1530_v31 = vand.u32 (!%p1513_p7), 4294901760, %v1517_v27  ;;  %v1533_v32 = vand.u32 (!%p1513_p7), 4294901760, %v1518_v28  ;;  %v1521_v44 = vld [vmem:[#allocation4 + $0x8] sm:$0xff] (!%p1513_p7)  ;;  %v4975_v29 = vld [vmem:[%s4662_s30 + $0x18] sm:$0xff] (!%p1513_p7) }
 0x34a   : > { %v1524_v47 = vsel (!%p1513_p7), %vm1522_vm1, %v1520_v30, 0  ;;  %v1527_v55 = vsel (!%p1513_p7), %vm1522_vm1, %v1521_v44, 0  ;;  %v4958_v16 = vld [vmem:[%s4662_s30] sm:$0xff] (!%p1513_p7)  ;;  %v4961_v37 = vld [vmem:[%s4662_s30 + $0x8] sm:$0xff] (!%p1513_p7)  ;;  %v2054_v41 = vand.u32 (!%p1513_p7), 4294901760, %v4972_v34  ;;  %v2057_v46 = vand.u32 (!%p1513_p7), 4294901760, %v4975_v29 }
 0x34b   : > { %v1596_v56 = vand.u32 (!%p1513_p7), 4294901760, %v1524_v47  ;;  %v3915_v45 = vpack.c.bf16 (!%p1513_p7), %v1533_v32, %v1530_v31  ;;  %v1606_v48 = vand.u32 (!%p1513_p7), 4294901760, %v1527_v55  ;;  %v1618_v57 = vsub.f32 (!%p1513_p7), %v1517_v27, %v1530_v31  ;;  %v4981_v51 = vld [vmem:[%s4662_s30 + $0x20] sm:$0xff] (!%p1513_p7)  ;;  %v4984_v54 = vld [vmem:[%s4662_s30 + $0x28] sm:$0xff] (!%p1513_p7)  ;;  %v4997_v5 = vld [vmem:[%s4662_s30 + $0x30] sm:$0xff] (!%p1513_p7) }
 0x34c   : > { %v1625_v58 = vsub.f32 (!%p1513_p7), %v1518_v28, %v1533_v32  ;;  %v2048_v22 = vand.u32 (!%p1513_p7), 4294901760, %v4958_v16  ;;  %v2051_v23 = vand.u32 (!%p1513_p7), 4294901760, %v4961_v37  ;;  %v4991_v59 = vpack.c.bf16 (!%p1513_p7), %v2057_v46, %v2054_v41  ;;  %v5000_v9 = vld [vmem:[%s4662_s30 + $0x38] sm:$0xff] (!%p1513_p7)  ;;  %v5014_v1 = vld [vmem:[%s4662_s30 + $0x40] sm:$0xff] (!%p1513_p7)  ;;  %v5017_v2 = vld [vmem:[%s4662_s30 + $0x48] sm:$0xff] (!%p1513_p7) }
 0x34d   : > { %v1597_v8 = vsub.f32 (!%p1513_p7), %v1524_v47, %v1596_v56  ;;  %3928 = vmatprep.subr.bf16.mxu0 (!%p1513_p7), %v3915_v45  ;;  %3916 = vmatprep.subr.bf16.mxu1 (!%p1513_p7), %v3915_v45  ;;  %v1607_v60 = vsub.f32 (!%p1513_p7), %v1527_v55, %v1606_v48  ;;  %v1619_v61 = vand.u32 (!%p1513_p7), 4294901760, %v1618_v57  ;;  %v2060_v0 = vand.u32 (!%p1513_p7), 4294901760, %v4981_v51  ;;  %v2041_v35 = vld [vmem:[%s4662_s30 + $0x50] sm:$0xff] (!%p1513_p7)  ;;  %v2042_v21 = vld [vmem:[%s4662_s30 + $0x58] sm:$0xff] (!%p1513_p7)  ;;  %v2043_v40 = vld [vmem:[%s4662_s30 + $0x60] sm:$0xff] (!%p1513_p7) }
 0x34e   : > { %v1626_v63 = vand.u32 (!%p1513_p7), 4294901760, %v1625_v58  ;;  %3930 = vmatpush3.bf16.msra.mxu0 (!%p1513_p7), %v3915_v45  ;;  %3918 = vmatpush3.bf16.msra.mxu1 (!%p1513_p7), %v3915_v45  ;;  %v3923_v15 = vpack.c.bf16 (!%p1513_p7), %v1625_v58, %v1618_v57  ;;  %v4969_v20 = vpack.c.bf16 (!%p1513_p7), %v2051_v23, %v2048_v22  ;;  %v2063_v33 = vand.u32 (!%p1513_p7), 4294901760, %v4984_v54  ;;  %v2044_v42 = vld [vmem:[%s4662_s30 + $0x68] sm:$0xff] (!%p1513_p7)  ;;  %v2045_v28 = vld [vmem:[%s4662_s30 + $0x70] sm:$0xff] (!%p1513_p7)  ;;  %v2046_v30 = vld [vmem:[%s4662_s30 + $0x78] sm:$0xff] (!%p1513_p7) }
 0x34f   : > { %v1598_v49 = vand.u32 (!%p1513_p7), 4294901760, %v1597_v8  ;;  %v1608_v52 = vand.u32 (!%p1513_p7), 4294901760, %v1607_v60  ;;  %v1620_v11 = vsub.f32 (!%p1513_p7), %v1618_v57, %v1619_v61  ;;  %v2066_v12 = vand.u32 (!%p1513_p7), 4294901760, %v4997_v5 }
 0x350   : > { %v1627_v50 = vsub.f32 %v1625_v58, %v1626_v63  ;;  %v3931_v53 = vpack.c.bf16 %v1626_v63, %v1619_v61  ;;  %v5007_v62 = vpack.c.bf16 %v2063_v33, %v2060_v0  ;;  %v2069_v13 = vand.u32 4294901760, %v5000_v9 }
 0x351   : > { %3472 = vmatprep.mubr.f32.mxu0 %v1598_v49  ;;  %v1599_v18 = vsub.f32 %v1597_v8, %v1598_v49  ;;  %v1609_v10 = vsub.f32 %v1607_v60, %v1608_v52  ;;  %v1621_v19 = vand.u32 4294901760, %v1620_v11  ;;  %v2072_v4 = vand.u32 4294901760, %v5014_v1 }
 0x352   : > { %3473 = vmatmul.mubr.f32.vlgmr.msra.gmra.mrb[0].mxu0 %v1608_v52  ;;  %v1628_v6 = vand.u32 4294901760, %v1627_v50  ;;  %3932 = vmatprep.subr.bf16.mxu0 %v3931_v53  ;;  %v5025_v3 = vpack.c.bf16 %v2069_v13, %v2066_v12  ;;  %v2075_v14 = vand.u32 4294901760, %v5017_v2  ;;  %v2078_v24 = vand.u32 4294901760, %v2041_v35 }
 0x353   : > { %v1600_v7 = vand.u32 4294901760, %v1599_v18  ;;  %3934 = vmatpush3.bf16.msra.mxu0 %v3931_v53  ;;  %3479 = vmatprep.mubr.f32.mxu0 %v1596_v56  ;;  %v1610_v36 = vand.u32 4294901760, %v1609_v10  ;;  %v2081_v25 = vand.u32 4294901760, %v2042_v21  ;;  %v2084_v43 = vand.u32 4294901760, %v2043_v40 }
 0x354   : > { %v3919_v38 = vpack.c.bf16 %v1628_v6, %v1621_v19  ;;  %3936 = vmatprep.subr.bf16.mxu0 %v3915_v45  ;;  %v5037_v17 = vpack.c.bf16 %v2075_v14, %v2072_v4  ;;  %v2087_v26 = vand.u32 4294901760, %v2044_v42  ;;  %v2090_v31 = vand.u32 4294901760, %v2045_v28 }
 0x355   : > { %3451 = vmatprep.mubr.f32.mxu1 %v1600_v7  ;;  %v5049_v39 = vpack.c.bf16 %v2081_v25, %v2078_v24  ;;  %v2093_v32 = vand.u32 4294901760, %v2046_v30  ;;  %v2150_v47 = vsub.f32 %v4958_v16, %v2048_v22  ;;  %v2157_v55 = vsub.f32 %v4961_v37, %v2051_v23 }
 0x356   : > { %3452 = vmatmul.mubr.f32.vlgmr.msra.gmra.mrb[0].mxu1 %v1610_v36  ;;  %3920 = vmatprep.subr.bf16.mxu1 %v3919_v38  ;;  %v5057_v27 = vpack.c.bf16 %v2087_v26, %v2084_v43  ;;  %v2220_v63 = vsub.f32 %v2041_v35, %v2078_v24  ;;  %v2227_v49 = vsub.f32 %v2042_v21, %v2081_v25 }
 0x357   : > { %3922 = vmatpush3.bf16.msra.mxu1 %v3919_v38  ;;  %3458 = vmatprep.mubr.f32.mxu1 %v1596_v56  ;;  %v5065_v44 = vpack.c.bf16 %v2093_v32, %v2090_v31  ;;  %v2234_v10 = vsub.f32 %v2043_v40, %v2084_v43  ;;  %v2241_v19 = vsub.f32 %v2044_v42, %v2087_v26 }
 0x358   : > { %3924 = vmatprep.subr.bf16.mxu1 %v3923_v15  ;;  %v2221_v52 = vand.u32 4294901760, %v2220_v63  ;;  %v2228_v11 = vand.u32 4294901760, %v2227_v49  ;;  %v2255_v22 = vsub.f32 %v2046_v30, %v2093_v32  ;;  %v5106_v32 = vsub.f32 %v4972_v34, %v2054_v41 }
 0x359   : > { %v2235_v16 = vand.u32 4294901760, %v2234_v10  ;;  %v2242_v37 = vand.u32 4294901760, %v2241_v19  ;;  %v5099_v30 = vpack.c.bf16 %v2241_v19, %v2234_v10  ;;  %v5123_v34 = vsub.f32 %v4984_v54, %v2063_v33 }
 0x35a   : > { %3480 = vmatmul.mubr.f32.vlgmr.msra.gmra.mrb[0].mxu0 %v1606_v48  ;;  %v5083_v50 = vpack.c.bf16 %v2228_v11, %v2221_v52  ;;  %v2222_v53 = vsub.f32 %v2220_v63, %v2221_v52  ;;  %v2229_v18 = vsub.f32 %v2227_v49, %v2228_v11  ;;  %v2256_v25 = vand.u32 4294901760, %v2255_v22 }
 0x35b   : > { %3938 = vmatpush3.bf16.msra.mxu0 %v3915_v45  ;;  %3486 = vmatprep.mubr.f32.mxu0 %v1596_v56  ;;  %v2151_v56 = vand.u32 4294901760, %v2150_v47  ;;  %v2158_v45 = vand.u32 4294901760, %v2157_v55  ;;  %v2236_v38 = vsub.f32 %v2234_v10, %v2235_v16  ;;  %v5087_v23 = vpack.c.bf16 %v2242_v37, %v2235_v16 }
 0x35c   : > { %3940 = vmatprep.subr.bf16.mxu0 %v4969_v20  ;;  %v2223_v6 = vand.u32 4294901760, %v2222_v53  ;;  %v2230_v7 = vand.u32 4294901760, %v2229_v18  ;;  %v2243_v35 = vsub.f32 %v2241_v19, %v2242_v37  ;;  %v2257_v42 = vsub.f32 %v2255_v22, %v2256_v25 }
 0x35d   : > { %v2152_v57 = vsub.f32 %v2150_v47, %v2151_v56  ;;  %v2159_v58 = vsub.f32 %v2157_v55, %v2158_v45  ;;  %v2237_v21 = vand.u32 4294901760, %v2236_v38  ;;  %v5136_v54 = vsub.f32 %v4997_v5, %v2066_v12 }
 0x35e   : > { %3459 = vmatmul.mubr.f32.vlgmr.msra.gmra.mrb[0].mxu1 %v1606_v48  ;;  %v5085_v36 = vpack.c.bf16 %v2230_v7, %v2223_v6  ;;  %v5144_v33 = vsub.f32 %v5000_v9, %v2069_v13  ;;  %v5159_v13 = vsub.f32 %v5014_v1, %v2072_v4 }
 0x35f   : > { %3926 = vmatpush3.bf16.msra.mxu1 %v3923_v15  ;;  %3465 = vmatprep.mubr.f32.mxu1 %v1597_v8  ;;  %v2153_v8 = vand.u32 4294901760, %v2152_v57  ;;  %v2248_v15 = vsub.f32 %v2045_v28, %v2090_v31  ;;  %v2258_v57 = vand.u32 4294901760, %v2257_v42  ;;  %v5097_v28 = vpack.c.bf16 %v2227_v49, %v2220_v63 }
 0x360   : > { %4036 = vmatprep.subr.bf16.mxu1 %v4969_v20  ;;  %v5118_v49 = vsub.f32 %v4981_v51, %v2060_v0  ;;  %v2186_v51 = vand.u32 4294901760, %v5123_v34  ;;  %v2200_v9 = vand.u32 4294901760, %v5144_v33 }
 0x361   : > { %v2249_v24 = vand.u32 4294901760, %v2248_v15  ;;  %v5101_v31 = vpack.c.bf16 %v2255_v22, %v2248_v15 }
 0x362   : > { %3487 = vmatmul.mubr.f32.vlgmr.msra.gmra.mrb[0].mxu0 %v1606_v48  ;;  %v5077_v48 = vpack.c.bf16 %v2158_v45, %v2151_v56  ;;  %v2244_v56 = vand.u32 4294901760, %v2243_v35  ;;  %v2179_v6 = vand.u32 4294901760, %v5118_v49  ;;  %v2187_v12 = vsub.f32 %v5123_v34, %v2186_v51 }
 0x363   : > { %3942 = vmatpush3.bf16.msra.mxu0 %v4969_v20  ;;  %v5089_v45 = vpack.c.bf16 %v2256_v25, %v2249_v24  ;;  %v2250_v40 = vsub.f32 %v2248_v15, %v2249_v24  ;;  %v2193_v35 = vand.u32 4294901760, %v5136_v54  ;;  %v5164_v24 = vsub.f32 %v5017_v2, %v2075_v14 }
 0x364   : > { %3944 = vmatprep.subr.bf16.mxu0 %v4991_v59  ;;  %v5091_v43 = vpack.c.bf16 %v2244_v56, %v2237_v21  ;;  %v2180_v5 = vsub.f32 %v5118_v49, %v2179_v6  ;;  %v2207_v2 = vand.u32 4294901760, %v5159_v13 }
 0x365   : > { %v2251_v26 = vand.u32 4294901760, %v2250_v40  ;;  %v2194_v1 = vsub.f32 %v5136_v54, %v2193_v35  ;;  %v2214_v14 = vand.u32 4294901760, %v5164_v24 }
 0x366   : > { %3466 = vmatmul.mubr.f32.vlgmr.msra.gmra.mrb[0].mxu1 %v1607_v60  ;;  %v2160_v60 = vand.u32 4294901760, %v2159_v58  ;;  %v2181_v42 = vand.u32 4294901760, %v2180_v5 }
 0x367   : > { %4038 = vmatpush3.bf16.msra.mxu1 %v4969_v20  ;;  %3946 = vmatpush3.bf16.msra.mxu0 %v4991_v59  ;;  %v5093_v58 = vpack.c.bf16 %v2258_v57, %v2251_v26  ;;  %v2188_v26 = vand.u32 4294901760, %v2187_v12  ;;  %v2201_v57 = vsub.f32 %v5144_v33, %v2200_v9 }
 0x368   : > { %4040 = vmatprep.subr.bf16.mxu1 %v4991_v59  ;;  %3948 = vmatprep.subr.bf16.mxu0 %v5007_v62  ;;  %v5080_v61 = vpack.c.bf16 %v2160_v60, %v2153_v8  ;;  %v5095_v8 = vpack.c.bf16 %v2157_v55, %v2150_v47  ;;  %v5111_v60 = vsub.f32 %v4975_v29, %v2057_v46  ;;  %v2165_v47 = vand.u32 4294901760, %v5106_v32 }
 0x36a   : > { %v2172_v55 = vand.u32 4294901760, %v5111_v60  ;;  %v2166_v18 = vsub.f32 %v5106_v32, %v2165_v47 }
 0x36b   : > { %4042 = vmatpush3.bf16.msra.mxu1 %v4991_v59  ;;  %3950 = vmatpush3.bf16.msra.mxu0 %v5007_v62 }
 0x36c   : > { %4044 = vmatprep.subr.bf16.mxu1 %v5007_v62  ;;  %3952 = vmatprep.subr.bf16.mxu0 %v5025_v3  ;;  %v2173_v10 = vsub.f32 %v5111_v60, %v2172_v55  ;;  %v4071_v37 = vpack.c.bf16 %v2172_v55, %v2165_v47  ;;  %v2167_v38 = vand.u32 4294901760, %v2166_v18  ;;  %v2195_v47 = vand.u32 4294901760, %v2194_v1 }
 0x36d   : > { %v2202_v55 = vand.u32 4294901760, %v2201_v57 }
 0x36e   : > { %v2174_v15 = vand.u32 4294901760, %v2173_v10 }
 0x36f   : > { %4046 = vmatpush3.bf16.msra.mxu1 %v5007_v62  ;;  %3954 = vmatpush3.bf16.msra.mxu0 %v5025_v3 }
 0x370   : > { %4048 = vmatprep.subr.bf16.mxu1 %v5025_v3  ;;  %3956 = vmatprep.subr.bf16.mxu0 %v5037_v17  ;;  %v3975_v56 = vpack.c.bf16 %v2174_v15, %v2167_v38 }
 0x373   : > { %4050 = vmatpush3.bf16.msra.mxu1 %v5025_v3  ;;  %3958 = vmatpush3.bf16.msra.mxu0 %v5037_v17 }
 0x374   : > { %4052 = vmatprep.subr.bf16.mxu1 %v5037_v17  ;;  %3960 = vmatprep.subr.bf16.mxu0 %v5049_v39 }
 0x377   : > { %4054 = vmatpush3.bf16.msra.mxu1 %v5037_v17  ;;  %3962 = vmatpush3.bf16.msra.mxu0 %v5049_v39 }
 0x378   : > { %4056 = vmatprep.subr.bf16.mxu1 %v5049_v39  ;;  %3964 = vmatprep.subr.bf16.mxu0 %v5057_v27 }
 0x37b   : > { %4058 = vmatpush3.bf16.msra.mxu1 %v5049_v39  ;;  %3966 = vmatpush3.bf16.msra.mxu0 %v5057_v27 }
 0x37c   : > { %4060 = vmatprep.subr.bf16.mxu1 %v5057_v27  ;;  %3968 = vmatprep.subr.bf16.mxu0 %v5065_v44 }
 0x37f   : > { %4062 = vmatpush3.bf16.msra.mxu1 %v5057_v27  ;;  %3970 = vmatpush3.bf16.msra.mxu0 %v5065_v44 }
 0x380   : > { %4064 = vmatprep.subr.bf16.mxu1 %v5065_v44  ;;  %3972 = vmatprep.subr.bf16.mxu0 %v5080_v61 }
 0x383   : > { %4066 = vmatpush3.bf16.msra.mxu1 %v5065_v44 }
 0x384   : > { %4068 = vmatprep.subr.bf16.mxu1 %v5077_v48 }
 0x435   : > { %v3488_v52 = vpop.f32.mrb[0].mxu0 }
 0x436   : > { %v2021_v11 = vpop.f32.mrb[1].mxu0 }
 0x439   : > { %v3467_v63 = vpop.f32.mrb[0].mxu1 }
 0x43a   : > { %v4151_v41 = vadd.f32 %v3488_v52, %v3467_v63  ;;  %v1775_v29 = vpop.f32.mrb[1].mxu1  ;;  %v4075_v52 = vpack.c.bf16 %v2186_v51, %v2179_v6  ;;  %v2208_v63 = vsub.f32 %v5159_v13, %v2207_v2 }
 0x43b   : > { %v4152_v46 = vadd.f32 %v2021_v11, %v1775_v29  ;;  %v4079_v11 = vpack.c.bf16 %v2200_v9, %v2193_v35  ;;  %v3983_v29 = vpack.c.bf16 %v2202_v55, %v2195_v47 }
 0x43c   : > { %v5125_v53 = vand.u32 4294901760, %v4151_v41 }
 0x43d   : > { %v5129_v19 = vand.u32 4294901760, %v4152_v46 }
 0x43e   : > { %v5139_v0 = vsub.f32 %v4151_v41, %v5125_v53  ;;  %v2215_v41 = vsub.f32 %v5164_v24, %v2214_v14 }
 0x43f   : > { %v5147_v7 = vsub.f32 %v4152_v46, %v5129_v19  ;;  %v4083_v46 = vpack.c.bf16 %v2214_v14, %v2207_v2 }
 0x440   : > { %v2140_v16 = vand.u32 4294901760, %v5139_v0  ;;  %v2216_v18 = vand.u32 4294901760, %v2215_v41 }
 0x441   : > { %v2130_v22 = vand.u32 4294901760, %v5147_v7 }
 0x442   : > { %v2141_v21 = vsub.f32 %v5139_v0, %v2140_v16 }
 0x443   : > { %3626 = vmatprep.mubr.f32.mxu1 %v2130_v22  ;;  %v2131_v25 = vsub.f32 %v5147_v7, %v2130_v22 }
 0x444   : > { %3627 = vmatmul.mubr.f32.vlgmr.msra.gmra.mrb[2].mxu1 %v2140_v16  ;;  %v2142_v4 = vand.u32 4294901760, %v2141_v21 }
 0x445   : > { %4070 = vmatpush3.bf16.msra.mxu1 %v5077_v48  ;;  %3661 = vmatprep.mubr.f32.mxu1 %v5129_v19  ;;  %v2132_v40 = vand.u32 4294901760, %v2131_v25  ;;  %v3979_v48 = vpack.c.bf16 %v2188_v26, %v2181_v42 }
 0x446   : > { %4072 = vmatprep.subr.bf16.mxu1 %v4071_v37 }
 0x447   : > { %3521 = vmatprep.mubr.f32.mxu0 %v2132_v40 }
 0x448   : > { %3522 = vmatmul.mubr.f32.vlgmr.msra.gmra.mrb[2].mxu0 %v2142_v4 }
 0x449   : > { %3974 = vmatpush3.bf16.msra.mxu0 %v5080_v61  ;;  %4074 = vmatpush3.bf16.msra.mxu1 %v4071_v37  ;;  %v2209_v61 = vand.u32 4294901760, %v2208_v63 }
 0x44a   : > { %3556 = vmatprep.mubr.f32.mxu0 %v5129_v19  ;;  %3976 = vmatprep.subr.bf16.mxu0 %v3975_v56 }
 0x44b   : > { %4076 = vmatprep.subr.bf16.mxu1 %v4075_v52  ;;  %v3987_v10 = vpack.c.bf16 %v2216_v18, %v2209_v61 }
 0x44d   : > { %3978 = vmatpush3.bf16.msra.mxu0 %v3975_v56  ;;  %4078 = vmatpush3.bf16.msra.mxu1 %v4075_v52 }
 0x44e   : > { %3980 = vmatprep.subr.bf16.mxu0 %v3979_v48  ;;  %4080 = vmatprep.subr.bf16.mxu1 %v4079_v11 }
 0x451   : > { %3982 = vmatpush3.bf16.msra.mxu0 %v3979_v48  ;;  %4082 = vmatpush3.bf16.msra.mxu1 %v4079_v11 }
 0x452   : > { %3984 = vmatprep.subr.bf16.mxu0 %v3983_v29  ;;  %4084 = vmatprep.subr.bf16.mxu1 %v4083_v46 }
 0x455   : > { %3986 = vmatpush3.bf16.msra.mxu0 %v3983_v29  ;;  %4086 = vmatpush3.bf16.msra.mxu1 %v4083_v46 }
 0x456   : > { %3988 = vmatprep.subr.bf16.mxu0 %v3987_v10  ;;  %4088 = vmatprep.subr.bf16.mxu1 %v5083_v50 }
 0x459   : > { %3990 = vmatpush3.bf16.msra.mxu0 %v3987_v10  ;;  %4090 = vmatpush3.bf16.msra.mxu1 %v5083_v50  ;;  %v4007_v50 = vpack.c.bf16 %v5111_v60, %v5106_v32 }
 0x45a   : > { %3992 = vmatprep.subr.bf16.mxu0 %v5085_v36  ;;  %4092 = vmatprep.subr.bf16.mxu1 %v5087_v23 }
 0x45d   : > { %3994 = vmatpush3.bf16.msra.mxu0 %v5085_v36  ;;  %4094 = vmatpush3.bf16.msra.mxu1 %v5087_v23  ;;  %v4015_v36 = vpack.c.bf16 %v5144_v33, %v5136_v54 }
 0x45e   : > { %3996 = vmatprep.subr.bf16.mxu0 %v5091_v43  ;;  %4096 = vmatprep.subr.bf16.mxu1 %v5089_v45 }
 0x461   : > { %3998 = vmatpush3.bf16.msra.mxu0 %v5091_v43  ;;  %4098 = vmatpush3.bf16.msra.mxu1 %v5089_v45 }
 0x462   : > { %4000 = vmatprep.subr.bf16.mxu0 %v5093_v58  ;;  %4100 = vmatprep.subr.bf16.mxu1 %v4969_v20 }
 0x464   : > { %3662 = vmatmul.mubr.f32.vlgmr.msra.gmra.mrb[2].mxu1 %v5125_v53 }
 0x465   : > { %4002 = vmatpush3.bf16.msra.mxu0 %v5093_v58  ;;  %4102 = vmatpush3.bf16.msra.mxu1 %v4969_v20  ;;  %v4011_v20 = vpack.c.bf16 %v5123_v34, %v5118_v49 }
 0x466   : > { %3696 = vmatprep.mubr.f32.mxu1 %v5129_v19  ;;  %4004 = vmatprep.subr.bf16.mxu0 %v5095_v8 }
 0x467   : > { %4104 = vmatprep.subr.bf16.mxu1 %v4991_v59 }
 0x468   : > { %3557 = vmatmul.mubr.f32.vlgmr.msra.gmra.mrb[2].mxu0 %v5125_v53 }
 0x469   : > { %4006 = vmatpush3.bf16.msra.mxu0 %v5095_v8  ;;  %3591 = vmatprep.mubr.f32.mxu0 %v5147_v7 }
 0x46a   : > { %4106 = vmatpush3.bf16.msra.mxu1 %v4991_v59  ;;  %4008 = vmatprep.subr.bf16.mxu0 %v4007_v50  ;;  %v4019_v59 = vpack.c.bf16 %v5164_v24, %v5159_v13 }
 0x46b   : > { %4108 = vmatprep.subr.bf16.mxu1 %v5007_v62 }
 0x46d   : > { %4010 = vmatpush3.bf16.msra.mxu0 %v4007_v50 }
 0x46e   : > { %4110 = vmatpush3.bf16.msra.mxu1 %v5007_v62  ;;  %4012 = vmatprep.subr.bf16.mxu0 %v4011_v20 }
 0x46f   : > { %4112 = vmatprep.subr.bf16.mxu1 %v5025_v3 }
 0x471   : > { %4014 = vmatpush3.bf16.msra.mxu0 %v4011_v20 }
 0x472   : > { %4114 = vmatpush3.bf16.msra.mxu1 %v5025_v3  ;;  %4016 = vmatprep.subr.bf16.mxu0 %v4015_v36 }
 0x473   : > { %4116 = vmatprep.subr.bf16.mxu1 %v5037_v17 }
 0x475   : > { %4018 = vmatpush3.bf16.msra.mxu0 %v4015_v36 }
 0x476   : > { %4118 = vmatpush3.bf16.msra.mxu1 %v5037_v17  ;;  %4020 = vmatprep.subr.bf16.mxu0 %v4019_v59 }
 0x477   : > { %4120 = vmatprep.subr.bf16.mxu1 %v5049_v39 }
 0x479   : > { %4022 = vmatpush3.bf16.msra.mxu0 %v4019_v59 }
 0x47a   : > { %4122 = vmatpush3.bf16.msra.mxu1 %v5049_v39  ;;  %4024 = vmatprep.subr.bf16.mxu0 %v5097_v28 }
 0x47b   : > { %4124 = vmatprep.subr.bf16.mxu1 %v5057_v27 }
 0x47d   : > { %4026 = vmatpush3.bf16.msra.mxu0 %v5097_v28 }
 0x47e   : > { %4126 = vmatpush3.bf16.msra.mxu1 %v5057_v27  ;;  %4028 = vmatprep.subr.bf16.mxu0 %v5099_v30 }
 0x47f   : > { %4128 = vmatprep.subr.bf16.mxu1 %v5065_v44 }
 0x481   : > { %4030 = vmatpush3.bf16.msra.mxu0 %v5099_v30 }
 0x482   : > { %4130 = vmatpush3.bf16.msra.mxu1 %v5065_v44  ;;  %4032 = vmatprep.subr.bf16.mxu0 %v5101_v31 }
 0x485   : > { %3697 = vmatmul.mubr.f32.vlgmr.msra.gmra.mrb[2].mxu1 %v5125_v53  ;;  %4034 = vmatpush3.bf16.msra.mxu0 %v5101_v31 }
 0x488   : > { %3592 = vmatmul.mubr.f32.vlgmr.msra.gmra.mrb[2].mxu0 %v5139_v0 }
 0x558   : > { %v3698_v62 = vpop.f32.mrb[2].mxu1 }
 0x559   : > { %v2721_v3 = vpop.f32.mrb[3].mxu1 }
 0x55b   : > { %v3593_v17 = vpop.f32.mrb[2].mxu0 }
 0x55c   : > { %v4153_v39 = vadd.f32 %v3698_v62, %v3593_v17  ;;  %v2405_v27 = vpop.f32.mrb[3].mxu0 }
 0x55d   : > { %v4154_v23 = vadd.f32 %v2721_v3, %v2405_v27 }
 0x55e   : > { %v2732_v43 = vmul.f32 %v4153_v39, %v4153_v39 }
 0x55f   : > { %v2731_v45 = vmul.f32 %v4154_v23, %v4154_v23 }
 0x561   : > { %2733 = vadd.xlane.f32.xlu0 %v2731_v45 }
 0x565   : > { %2735 = vadd.xlane.f32.xlu0 %v2732_v43 }
 0x5ee   : > { %v2734_v58 = vpop.xlane.xlu0 %2733 }
 0x5ef   : > { %v2737_v44 = vmax.f32 %v2734_v58, 1e-24 }
 0x5f1   : > { %4267 = vrsqrt.f32 %v2737_v44 }
 0x5f2   : > { %v2736_v8 = vpop.xlane.xlu0 %2735 }
 0x5f3   : > { %v2738_v28 = vmax.f32 %v2736_v8, 1e-24 }
 0x5f5   : > { %4269 = vrsqrt.f32 %v2738_v28 }
 0x5fb   : > { %v4268_v30 = vpop.eup %4267 }
 0x5fc   : > { %v2741_v31 = vmul.f32 %v4268_v30, %v4154_v23  ;;  %2747 = sbr.rel (%p2918_p13) target bundleno = 1541 (0x605), region = 68 }
 0x5fe   : > { %v2743_v32 = vmul.f32 0.33333334, %v2741_v31 }
 0x5ff   : > { %v4270_v60 = vpop.eup %4269 }
 0x600   : > { %v2742_v49 = vmul.f32 %v4270_v60, %v4153_v39  ;;  %2749 = vst [vmem:[#allocation3] sm:$0xff] (!%p2918_p13), %v2743_v32 }
 0x602   : > { %v2744_v34 = vmul.f32 0.33333334, %v2742_v49 }
 0x604   : > { %2750 = vst [vmem:[#allocation3 + $0x8] sm:$0xff] %v2744_v34 }
 0x605 PF: > { %p2751_p2 = scmp.gt.s32.totalorder %s4437_s15, 0  ;;  %p2752_p3 = scmp.lt.s32.totalorder %s4437_s15, 1 }
 0x607   : > { %p2753_p8 = pnand %p2752_p3, %p2751_p2 }
 0x609   : > { %2756 = sbr.rel (%p2753_p8) target bundleno = 1552 (0x610), region = 72  ;;  %v2758_v53 = vld [vmem:[#allocation3] sm:$0xff] (!%p2753_p8) }
 0x60a   : > { %v2760_v6 = vadd.f32 (!%p2753_p8), %v2758_v53, %v2743_v32 }
 0x60b   : > { %v2759_v19 = vld [vmem:[#allocation3 + $0x8] sm:$0xff] (!%p2753_p8) }
 0x60c   : > { %v2761_v51 = vadd.f32 (!%p2753_p8), %v2759_v19, %v2744_v34  ;;  %2762 = vst [vmem:[#allocation3] sm:$0xff] (!%p2753_p8), %v2760_v6 }
 0x60e   : > { %2763 = vst [vmem:[#allocation3 + $0x8] sm:$0xff] (!%p2753_p8), %v2761_v51 }
 0x610 PF: > { %p2925_p6 = scmp.ne.s32.totalorder %s4437_s15, 1 }
 0x612   : > { %2767 = sbr.rel (%p2925_p6) target bundleno = 1561 (0x619), region = 76 }
 0x613   : > { %v2769_v54 = vld [vmem:[#allocation3] sm:$0xff] (!%p2925_p6) }
 0x614   : > { %v2771_v33 = vadd.f32 (!%p2925_p6), %v2769_v54, %v2743_v32 }
 0x615   : > { %v2770_v0 = vld [vmem:[#allocation3 + $0x8] sm:$0xff] (!%p2925_p6) }
 0x616   : > { %v2772_v7 = vadd.f32 (!%p2925_p6), %v2770_v0, %v2744_v34  ;;  %2773 = vst [vmem:[#allocation10] sm:$0xff] (!%p2925_p6), %v2771_v33 }
 0x618   : > { %2774 = vst [vmem:[#allocation10 + $0x8] sm:$0xff] (!%p2925_p6), %v2772_v7 }
 0x619 PF: > { %p4205_p13 = scmp.eq.s32.totalorder %s4504_s18, 1  ;;  %s4452_s28 = smov [#allocation10]  }
 0x61a   : > { %s2791_s26 = sshll.u32 %s4452_s28, 4  ;;  %s2792_s26 = int_to_ptr.vmem [resolvable:$true] %s2791_s26 }
 0x61b   : > { %s4357_s29 = scalar_lea.vmem %s2792_s26, 256  ;;  %s4363_s15 = scalar_lea.vmem %s2792_s26, 512 }
 0x61c   : > { %p4358_p1 = scmp.ne.s32.totalorder %s2792_s26, %s4357_s29  ;;  %p4364_p5 = scmp.lt.s32.totalorder %s2792_s26, %s2792_s26 }
 0x61d   : > { %p4365_p9 = scmp.lt.s32.totalorder %s4363_s15, %s4357_s29 }
 0x61e   : > { %p4359_p12 = pnand %p4358_p1, %p4205_p13 }
 0x61f   : > { %p4366_p11 = por %p4365_p9, %p4364_p5 }
 0x620   : > { %p4360_p10 = pneg %p4359_p12 }
 0x622   : > { %p4367_p0 = pnand %p4366_p11, %p4360_p10 }
 0x624   : > { %4370 = shalt.err (!%p4367_p0)
}
 0x625   : > { %s4371_s27 = scalar_lea.hbm %s5276_s3, 256 }
 0x626   : > { %p4372_p4 = scmp.ne.s32.totalorder %s5276_s3, %s4371_s27  ;;  %p4377_p3 = scmp.lt.u32.totalorder %s4371_s27, %s5276_s3 }
 0x628   : > { %p4373_p7 = pnand %p4372_p4, %p4205_p13 }
 0x62a   : > { %p4374_p2 = pneg %p4373_p7 }
 0x62c   : > { %p4379_p8 = pnand %p4377_p3, %p4374_p2 }
 0x62e   : > { %4382 = shalt.err (!%p4379_p8)
}
 0x62f   : > { %s4453_s21 = smov 128   ;;  %s4454_s30 = smov 8  }
 0x630   : > { %4182 = dma.vmem_to_hbm [thread:$0]  (%p4205_p13), %s2792_s26, 256, %s5276_s3, [#allocation6], %s4453_s21, %s4453_s21, %s4454_s30  }
 0x631 PF: > { %p4207_p6 = scmp.eq.s32.totalorder %s2906_s19, 1  ;;  %p5289_p1 = scmp.ge.s32.totalorder %s4445_s17, 2 }
 0x633   : > { %p4197_p12 = pnand %p4207_p6, %p5289_p1 }
 0x635   : > { %4420 = dma.done.wait (!%p4197_p12), [#allocation6], 256  }
 0x636   : > { %4422 = vsyncadd (!%p4197_p12), [#allocation6], 4294967040  ;;  %s18_s17 = sadd.s32 1, %s4445_s17   ;;  %s5290_s12 = smov %s4429_s13 }
 0x637   : > { %p15_p10 = scmp.ge.s32.totalorder %s18_s17, 4   ;;  %s5291_s13 = smov %s4433_s14 }
 0x638   : > { %s5292_s14 = smov %s4617_s23  ;;  %s5293_s15 = smov %s4441_s16 }
 0x639   : > { %s5294_s16 = smov %s5296_s11  ;;  %17 = sbr.rel (!%p15_p10) target bundleno = 6 (0x6), region = 123 }
 0x640   :  { %2812 = vsyncpa [#allocation5], 1 }
 0x641   :  { %2814 = vsyncpa [#allocation5 + $0x1], 1 }
 0x642   :  { %2815 = vsyncpa [#allocation8], 1 }
 0x643   :  { %2816 = vsyncpa [#allocation6], 1 }
 0x644   :  { %2818 = vsyncpa [#allocation6 + $0x1], 1 }

</bundles_post_ra>
